<compile_context>
chip_gen: v6e
topology: v6e:2x2x1
jax: 0.10.0
libtpu: 0.0.40
codegen_flags: <defaults>
</compile_context>

<pallas_src>
import math

import numpy as np
import jax
import jax.numpy as jnp
from jax.experimental import pallas as pl
from jax.experimental.pallas import tpu as pltpu

LANE = 128                       # channel padding (TPU lane width)
ACT_DTYPE = jnp.bfloat16         # activation / conv-weight storage dtype

IDENTITY_OP = {"kind": "id", "k": 0, "relu": False}


def _round_up(x, m):
    return ((x + m - 1) // m) * m


# ----------------------------------------------------------------------------
# Fused "sum of ops" kernel: out = sum_i op_i(x_i), ops in {id, conv, dw, max, avg}
# with folded BN scale/bias (+ optional ReLU) per op.  One invocation per image.
# ----------------------------------------------------------------------------
def _make_fused_sum_kernel(specs, H, W, Cp, out_dtype):
    """specs: tuple of (kind, k, relu) per term (static).

    Ref order per grid step:
      for each term: x_ref, [w_ref, scale_ref, bias_ref]   (conv/dw only)
      out_ref,
      sum_scratch (M,Cp) f32, [tap_scratch (M,Cp) f32],
      [pad_scratch (1,H+2p,W+2p,Cp) f32 per windowed term, in term order]
    """
    M = H * W
    n_windowed = sum(1 for kind, _, _ in specs if kind != "id")

    def kernel(*refs):
        it = iter(refs)
        term_refs = []
        for kind, _, _ in specs:
            x_ref = next(it)
            if kind in ("conv", "dw"):
                w_ref, s_ref, b_ref = next(it), next(it), next(it)
            else:
                w_ref = s_ref = b_ref = None
            term_refs.append((x_ref, w_ref, s_ref, b_ref))
        out_ref = next(it)
        sum_ref = next(it)
        tap_ref = next(it) if n_windowed else None
        pad_refs = [next(it) for _ in range(n_windowed)]

        sum_ref[...] = jnp.zeros(sum_ref.shape, sum_ref.dtype)
        wi = 0
        for (kind, k, relu), (x_ref, w_ref, s_ref, b_ref) in zip(specs, term_refs):
            if kind == "id":
                sum_ref[...] += x_ref[...].astype(jnp.float32).reshape(M, Cp)
                continue

            p = k // 2
            pad_ref = pad_refs[wi]
            wi += 1
            fill = float("-inf") if kind == "max" else 0.0
            pad_ref[...] = jnp.full(pad_ref.shape, fill, pad_ref.dtype)
            pad_ref[:, p:p + H, p:p + W, :] = x_ref[...].astype(jnp.float32)

            if kind == "max":
                tap_ref[...] = jnp.full(tap_ref.shape, float("-inf"), tap_ref.dtype)
            else:
                tap_ref[...] = jnp.zeros(tap_ref.shape, tap_ref.dtype)

            for di in range(k):
                for dj in range(k):
                    t = di * k + dj
                    win = pad_ref[:, di:di + H, dj:dj + W, :].reshape(M, Cp)
                    if kind == "conv":        # implicit-im2col MXU accumulation
                        tap_ref[...] += jnp.dot(win.astype(jnp.bfloat16), w_ref[t],
                                                preferred_element_type=jnp.float32)
                    elif kind == "dw":        # depthwise: per-channel VPU taps
                        tap_ref[...] += win * w_ref[t:t + 1, :]
                    elif kind == "max":
                        tap_ref[...] = jnp.maximum(tap_ref[...], win)
                    else:                     # avg (count_include_pad=True)
                        tap_ref[...] += win

            y = tap_ref[...]
            if kind == "avg":
                y = y * (1.0 / (k * k))
            if kind in ("conv", "dw"):
                y = y * s_ref[...] + b_ref[...]   # folded BatchNorm (eval mode)
            if relu:
                y = jnp.maximum(y, 0.0)
            sum_ref[...] += y

        out_ref[...] = sum_ref[...].reshape(1, H, W, Cp).astype(out_dtype)

    return kernel


def _const_index_map(ndim):
    return lambda n: (0,) * ndim


def _batch_index_map(n):
    return (n, 0, 0, 0)


def fused_sum(terms, out_dtype=ACT_DTYPE):
    """terms: list of (op_params, x) with x of shape (N, H, W, Cp).
    Returns sum over terms of op(x), computed in a single pallas_call."""
    N, H, W, Cp = terms[0][1].shape
    M = H * W

    specs, inputs, in_specs = [], [], []
    flops = 0
    bytes_accessed = 0
    for op, x in terms:
        kind = op["kind"]
        k = int(op.get("k", 0))
        relu = bool(op.get("relu", False))
        specs.append((kind, k, relu))
        inputs.append(x)
        in_specs.append(pl.BlockSpec((1, H, W, Cp), _batch_index_map))
        bytes_accessed += int(x.size) * x.dtype.itemsize
        if kind in ("conv", "dw"):
            for arr in (op["w"], op["scale"], op["bias"]):
                inputs.append(arr)
                in_specs.append(pl.BlockSpec(arr.shape, _const_index_map(arr.ndim)))
                bytes_accessed += int(arr.size) * arr.dtype.itemsize
            if kind == "conv":
                flops += 2 * N * M * Cp * Cp * k * k
            else:
                flops += 2 * N * M * Cp * k * k
    bytes_accessed += N * M * Cp * jnp.dtype(out_dtype).itemsize

    scratch = [pltpu.VMEM((M, Cp), jnp.float32)]          # running sum
    windowed = [s for s in specs if s[0] != "id"]
    if windowed:
        scratch.append(pltpu.VMEM((M, Cp), jnp.float32))  # per-op tap accumulator
        for _, k, _ in windowed:
            p = k // 2
            scratch.append(pltpu.VMEM((1, H + 2 * p, W + 2 * p, Cp), jnp.float32))

    kernel = _make_fused_sum_kernel(tuple(specs), H, W, Cp, out_dtype)
    return pl.pallas_call(
        kernel,
        out_shape=jax.ShapeDtypeStruct((N, H, W, Cp), out_dtype),
        grid=(N,),
        in_specs=in_specs,
        out_specs=pl.BlockSpec((1, H, W, Cp), _batch_index_map),
        scratch_shapes=scratch,
        compiler_params=pltpu.CompilerParams(dimension_semantics=("parallel",)),
        cost_estimate=pl.CostEstimate(flops=flops, transcendentals=0,
                                      bytes_accessed=bytes_accessed),
    )(*inputs)


# ----------------------------------------------------------------------------
# Fused 1x1-conv (matmul) + BN kernel (used by the factorized reduction)
# ----------------------------------------------------------------------------
def _matmul_bn_kernel(x_ref, w_ref, s_ref, b_ref, o_ref):
    y = jnp.dot(x_ref[...], w_ref[...], preferred_element_type=jnp.float32)
    o_ref[...] = (y * s_ref[...] + b_ref[...]).astype(o_ref.dtype)


def matmul_bn(x2d, w, scale, bias, out_dtype=ACT_DTYPE):
    M, K = x2d.shape
    Nc = w.shape[1]
    return pl.pallas_call(
        _matmul_bn_kernel,
        out_shape=jax.ShapeDtypeStruct((M, Nc), out_dtype),
        cost_estimate=pl.CostEstimate(
            flops=2 * M * K * Nc, transcendentals=0,
            bytes_accessed=int(x2d.size) * x2d.dtype.itemsize
            + int(w.size) * w.dtype.itemsize
            + M * Nc * jnp.dtype(out_dtype).itemsize),
    )(x2d, w, scale, bias)


# ----------------------------------------------------------------------------
# Module building blocks
# ----------------------------------------------------------------------------
def factorized_reduction(x, p):
    # TODO(synk): aux.FactorizedReduction source not provided; approximated as a
    # 2x2 stride-2 average pool (cheap XLA fusion) + 1x1 conv + BN, channels kept.
    N, H, W, Cp = x.shape
    Ho, Wo = H // 2, W // 2
    avg = x.reshape(N, Ho, 2, Wo, 2, Cp).astype(jnp.float32).mean(axis=(2, 4))
    avg = avg.astype(ACT_DTYPE).reshape(N * Ho * Wo, Cp)
    out = matmul_bn(avg, p["w"], p["scale"], p["bias"])
    return out.reshape(N, Ho, Wo, Cp)


def cell_forward(blocks, s0, s1, connections):
    # TODO(synk): aux.Cell source not provided; DARTS/ENAS-style micro-cell:
    #   block_b = op1(state[con1]) + op2(state[con2]); cell output = sum of blocks.
    states = [s0, s1]          # con -2 -> states[0], -1 -> states[1], block j -> states[j+2]
    B = len(blocks)
    block_vals = []
    cell_out = None
    for b, (p1, p2) in enumerate(blocks):
        c1, c2 = int(connections[b, 0]), int(connections[b, 1])
        terms = [(p1, states[c1 + 2]), (p2, states[c2 + 2])]
        if b == B - 1:
            # fold the final cell-output sum (all earlier block values) into this call
            terms += [(IDENTITY_OP, v) for v in block_vals]
            cell_out = fused_sum(terms)
        else:
            v = fused_sum(terms)
            states.append(v)
            block_vals.append(v)
    return cell_out


# ----------------------------------------------------------------------------
# Deterministic parameter construction (eval-mode BN folded into scale/bias)
# ----------------------------------------------------------------------------
CONV_KSIZE = {1: 3, 2: 5}
DW_KSIZE = {3: 3, 4: 5, 5: 7}


class KeyGen:
    def __init__(self, seed=0):
        self.key = jax.random.PRNGKey(seed)

    def __call__(self):
        self.key, k = jax.random.split(self.key)
        return k


def _kaiming(keygen, shape, fan_in):
    bound = math.sqrt(6.0 / fan_in)
    return jax.random.uniform(keygen(), shape, jnp.float32, -bound, bound)


def _bn_fold(C, Cp, eps=1e-5):
    # eval-mode BatchNorm: gamma=1, beta=0, running_mean=0, running_var=1
    scale = jnp.concatenate([jnp.full((C,), 1.0 / math.sqrt(1.0 + eps), jnp.float32),
                             jnp.ones((Cp - C,), jnp.float32)])
    bias = jnp.zeros((Cp,), jnp.float32)
    return scale.reshape(1, Cp), bias.reshape(1, Cp)


def _pad_conv_w(w, Cp):
    kk, cin, cout = w.shape
    return jnp.pad(w, ((0, 0), (0, Cp - cin), (0, Cp - cout))).astype(jnp.bfloat16)


def _pad_dw_w(w, Cp):
    kk, c = w.shape
    return jnp.pad(w, ((0, 0), (0, Cp - c)))      # f32, VPU path


def make_op_params(keygen, op_id, C, Cp):
    if op_id == 0:                                # 'I'
        return dict(IDENTITY_OP)
    if op_id in CONV_KSIZE:                       # 3x3 / 5x5 conv
        k = CONV_KSIZE[op_id]
        s, b = _bn_fold(C, Cp)
        w = _kaiming(keygen, (k * k, C, C), fan_in=k * k * C)
        return {"kind": "conv", "k": k, "relu": True,
                "w": _pad_conv_w(w, Cp), "scale": s, "bias": b}
    if op_id in DW_KSIZE:                         # 3x3 / 5x5 / 7x7 depthconv
        k = DW_KSIZE[op_id]
        s, b = _bn_fold(C, Cp)
        w = _kaiming(keygen, (k * k, C), fan_in=k * k)
        return {"kind": "dw", "k": k, "relu": True,
                "w": _pad_dw_w(w, Cp), "scale": s, "bias": b}
    if op_id == 6:
        return {"kind": "max", "k": 3, "relu": False}
    if op_id == 7:
        return {"kind": "avg", "k": 3, "relu": False}
    raise ValueError(f"unknown op id {op_id}")


def make_params(args, conf_idx):
    keygen = KeyGen(0)
    P, num_out = args["planes"], args["num_outputs"]
    Cp = _round_up(max(P, 3), LANE)
    params = {"Cp": Cp}

    # input_conv: Conv2d(3, planes, 3, pad=1, bias=False) + BatchNorm2d(planes, eps=1e-3)
    s_in, b_in = _bn_fold(P, Cp, eps=1e-3)
    w_in = _kaiming(keygen, (9, 3, P), fan_in=3 * 3 * 3)
    params["input_conv"] = {"kind": "conv", "k": 3, "relu": False,
                            "w": _pad_conv_w(w_in, Cp), "scale": s_in, "bias": b_in}

    cells, pools = [], []
    for n_cells_so_far, layer_red in enumerate(args["net_str"], start=1):
        blocks = []
        for b in range(conf_idx.shape[0]):
            blocks.append((make_op_params(keygen, int(conf_idx[b, 0]), P, Cp),
                           make_op_params(keygen, int(conf_idx[b, 1]), P, Cp)))
        cells.append(blocks)
        if layer_red == 2:
            for _ in range(n_cells_so_far + 1):
                s, bch = _bn_fold(P, Cp)
                w1 = _kaiming(keygen, (P, P), fan_in=P)
                pools.append({"w": jnp.pad(w1, ((0, Cp - P), (0, Cp - P))).astype(jnp.bfloat16),
                              "scale": s, "bias": bch})
    params["cells"], params["pools"] = cells, pools

    bound = 1.0 / math.sqrt(P)
    params["cls_w"] = jax.random.uniform(keygen(), (P, num_out), jnp.float32, -bound, bound)
    params["cls_b"] = jax.random.uniform(keygen(), (num_out,), jnp.float32, -bound, bound)
    # TODO(synk): aux.AuxiliaryHead source not provided; approximated as ReLU -> GAP -> Linear.
    params["aux_w"] = jax.random.uniform(keygen(), (P, num_out), jnp.float32, -bound, bound)
    params["aux_b"] = jax.random.uniform(keygen(), (num_out,), jnp.float32, -bound, bound)
    return params


# ----------------------------------------------------------------------------
# Full forward pass (mirrors Searchable_MicroCNN.forward, eval mode)
# ----------------------------------------------------------------------------
def searchable_micro_cnn_forward(params, x_nchw, args, connections):
    P = args["planes"]
    Cp = params["Cp"]

    x = jnp.transpose(x_nchw, (0, 2, 3, 1)).astype(jnp.float32)          # NCHW -> NHWC
    x = jnp.pad(x, ((0, 0), (0, 0), (0, 0), (0, Cp - 3))).astype(ACT_DTYPE)  # lane-pad once

    cell_outputs = [fused_sum([(params["input_conv"], x)])]
    pool_id = 0
    index_cell = 0
    for index_cell, blocks in enumerate(params["cells"]):
        if index_cell == 0:
            co = cell_forward(blocks, cell_outputs[0], cell_outputs[0], connections)
        else:
            co = cell_forward(blocks, cell_outputs[-2], cell_outputs[-1], connections)
        cell_outputs.append(co)
        if args["net_str"][index_cell] == 2:
            for idx in range(len(cell_outputs)):
                cell_outputs[idx] = factorized_reduction(cell_outputs[idx],
                                                         params["pools"][pool_id])
                pool_id += 1

    # Heads: GAP over 2x(P=8) rows + (P x num_out) linear -> pure XLA (kernel
    # launches here would be >98% padding; dropout is eval-mode identity).
    def head(feat, w, b, relu):
        g = feat[..., :P].astype(jnp.float32)
        if relu:
            g = jnp.maximum(g, 0.0)
        g = jnp.mean(g, axis=(1, 2))
        return g @ w + b

    out = head(cell_outputs[-1], params["cls_w"], params["cls_b"], relu=False)
    iout = head(cell_outputs[int(index_cell * 0.666)],
                params["aux_w"], params["aux_b"], relu=True)
    return out, iout


if __name__ == "__main__":
    args = {"planes": 8, "img_size": 16, "num_outputs": 10,
            "net_str": (1, 2, 1), "drop_prob": 0.0}
    # conf = [[op1 op2 con1 con2]]: ops in [0, 8), cons in [-2, block_idx-1]
    configuration = np.array([[1, 6, -2, -1],      # 3x3 conv(s-2) + 3x3 maxpool(s-1)
                              [4, 0, -1, 0]],      # 5x5 depthconv(s-1) + identity(block0)
                             dtype=np.int32)
    conf_idx = configuration[:, 0:2]
    connections = configuration[:, 2:]

    params = make_params(args, conf_idx)
    x = jax.random.normal(jax.random.PRNGKey(0),
                          (2, 3, args["img_size"], args["img_size"]), jnp.float32)

    out, iout = searchable_micro_cnn_forward(params, x, args, connections)
    out, iout = jax.block_until_ready((out, iout))
    assert out.shape == (2, args["num_outputs"]), out.shape
    assert iout.shape == (2, args["num_outputs"]), iout.shape
    assert bool(jnp.all(jnp.isfinite(out))) and bool(jnp.all(jnp.isfinite(iout)))
    print("KERNEL_OK")
</pallas_src>

<mosaic_0001>
module attributes {stable_mosaic.version = 11 : i64} {
  func.func @kernel(%arg0: i32, %arg1: memref<1x16x16x128xbf16, #tpu.memory_space<vmem>>, %arg2: memref<9x128x128xbf16, #tpu.memory_space<vmem>>, %arg3: memref<1x128xf32, #tpu.memory_space<vmem>>, %arg4: memref<1x128xf32, #tpu.memory_space<vmem>>, %arg5: memref<1x16x16x128xbf16, #tpu.memory_space<vmem>>, %arg6: memref<256x128xf32, #tpu.memory_space<vmem>>, %arg7: memref<256x128xf32, #tpu.memory_space<vmem>>, %arg8: memref<1x18x18x128xf32, #tpu.memory_space<vmem>>) attributes {dimension_semantics = [#tpu.dimension_semantics<parallel>], iteration_bounds = array<i64: 2>, scalar_prefetch = 0 : i64, scratch_operands = 3 : i64, tpu.core_type = #tpu.core_type<tc>, window_params = [{transform_indices = @transform_0, window_bounds = array<i64: 1, 16, 16, 128>}, {pipeline_mode = #tpu.pipeline_mode<synchronous>, transform_indices = @transform_1, window_bounds = array<i64: 9, 128, 128>}, {pipeline_mode = #tpu.pipeline_mode<synchronous>, transform_indices = @transform_2, window_bounds = array<i64: 1, 128>}, {pipeline_mode = #tpu.pipeline_mode<synchronous>, transform_indices = @transform_3, window_bounds = array<i64: 1, 128>}, {transform_indices = @transform_4, window_bounds = array<i64: 1, 16, 16, 128>}]} {
    %cst = arith.constant 0.000000e+00 : f32
    %0 = vector.broadcast %cst : f32 to vector<256x128xf32>
    %c0 = arith.constant 0 : index
    %c0_0 = arith.constant 0 : index
    %1 = vector.load %arg6[%c0, %c0_0] : memref<256x128xf32, #tpu.memory_space<vmem>>, vector<256x128xf32>
    tpu.vector_store %arg6[%c0, %c0_0], %0 {strides = array<i32>} : memref<256x128xf32, #tpu.memory_space<vmem>>, vector<256x128xf32>,
    %cst_1 = arith.constant 0.000000e+00 : f32
    %2 = vector.broadcast %cst_1 : f32 to vector<1x18x18x128xf32>
    %c0_2 = arith.constant 0 : index
    %c0_3 = arith.constant 0 : index
    %c0_4 = arith.constant 0 : index
    %c0_5 = arith.constant 0 : index
    %3 = vector.load %arg8[%c0_2, %c0_3, %c0_4, %c0_5] : memref<1x18x18x128xf32, #tpu.memory_space<vmem>>, vector<1x18x18x128xf32>
    tpu.vector_store %arg8[%c0_2, %c0_3, %c0_4, %c0_5], %2 {strides = array<i32>} : memref<1x18x18x128xf32, #tpu.memory_space<vmem>>, vector<1x18x18x128xf32>,
    %c0_6 = arith.constant 0 : index
    %c0_7 = arith.constant 0 : index
    %c0_8 = arith.constant 0 : index
    %c0_9 = arith.constant 0 : index
    %4 = vector.load %arg1[%c0_6, %c0_7, %c0_8, %c0_9] : memref<1x16x16x128xbf16, #tpu.memory_space<vmem>>, vector<1x16x16x128xbf16>
    %5 = arith.extf %4 : vector<1x16x16x128xbf16> to vector<1x16x16x128xf32>
    %c0_10 = arith.constant 0 : index
    %c1 = arith.constant 1 : index
    %c1_11 = arith.constant 1 : index
    %c0_12 = arith.constant 0 : index
    %6 = vector.load %arg8[%c0_10, %c1, %c1_11, %c0_12] : memref<1x18x18x128xf32, #tpu.memory_space<vmem>>, vector<1x16x16x128xf32>
    tpu.vector_store %arg8[%c0_10, %c1, %c1_11, %c0_12], %5 {strides = array<i32>} : memref<1x18x18x128xf32, #tpu.memory_space<vmem>>, vector<1x16x16x128xf32>,
    %cst_13 = arith.constant 0.000000e+00 : f32
    %7 = vector.broadcast %cst_13 : f32 to vector<256x128xf32>
    %c0_14 = arith.constant 0 : index
    %c0_15 = arith.constant 0 : index
    %8 = vector.load %arg7[%c0_14, %c0_15] : memref<256x128xf32, #tpu.memory_space<vmem>>, vector<256x128xf32>
    tpu.vector_store %arg7[%c0_14, %c0_15], %7 {strides = array<i32>} : memref<256x128xf32, #tpu.memory_space<vmem>>, vector<256x128xf32>,
    %c0_16 = arith.constant 0 : index
    %c0_17 = arith.constant 0 : index
    %c0_18 = arith.constant 0 : index
    %c0_19 = arith.constant 0 : index
    %9 = vector.load %arg8[%c0_16, %c0_17, %c0_18, %c0_19] : memref<1x18x18x128xf32, #tpu.memory_space<vmem>>, vector<1x16x16x128xf32>
    %10 = vector.shape_cast %9 : vector<1x16x16x128xf32> to vector<256x128xf32>
    %c0_20 = arith.constant 0 : index
    %c0_21 = arith.constant 0 : index
    %11 = vector.load %arg7[%c0_20, %c0_21] : memref<256x128xf32, #tpu.memory_space<vmem>>, vector<256x128xf32>
    %12 = arith.truncf %10 : vector<256x128xf32> to vector<256x128xbf16>
    %c0_22 = arith.constant 0 : index
    %c0_23 = arith.constant 0 : index
    %c0_24 = arith.constant 0 : index
    %13 = vector.load %arg2[%c0_22, %c0_23, %c0_24] : memref<9x128x128xbf16, #tpu.memory_space<vmem>>, vector<1x128x128xbf16>
    %14 = vector.shape_cast %13 : vector<1x128x128xbf16> to vector<128x128xbf16>
    %cst_25 = arith.constant dense<0.000000e+00> : vector<256x128xf32>
    %15 = tpu.matmul %12, %14, %cst_25 {dimension_numbers = #tpu.dot_dimension_numbers<[1], [0], [0], [1], [0, 0, 1, 1], [], []>} : vector<256x128xbf16>, vector<128x128xbf16>, vector<256x128xf32> -> vector<256x128xf32>
    %16 = arith.addf %11, %15 : vector<256x128xf32>
    %c0_26 = arith.constant 0 : index
    %c0_27 = arith.constant 0 : index
    %17 = vector.load %arg7[%c0_26, %c0_27] : memref<256x128xf32, #tpu.memory_space<vmem>>, vector<256x128xf32>
    tpu.vector_store %arg7[%c0_26, %c0_27], %16 {strides = array<i32>} : memref<256x128xf32, #tpu.memory_space<vmem>>, vector<256x128xf32>,
    %c0_28 = arith.constant 0 : index
    %c0_29 = arith.constant 0 : index
    %c1_30 = arith.constant 1 : index
    %c0_31 = arith.constant 0 : index
    %18 = vector.load %arg8[%c0_28, %c0_29, %c1_30, %c0_31] : memref<1x18x18x128xf32, #tpu.memory_space<vmem>>, vector<1x16x16x128xf32>
    %19 = vector.shape_cast %18 : vector<1x16x16x128xf32> to vector<256x128xf32>
    %c0_32 = arith.constant 0 : index
    %c0_33 = arith.constant 0 : index
    %20 = vector.load %arg7[%c0_32, %c0_33] : memref<256x128xf32, #tpu.memory_space<vmem>>, vector<256x128xf32>
    %21 = arith.truncf %19 : vector<256x128xf32> to vector<256x128xbf16>
    %c1_34 = arith.constant 1 : index
    %c0_35 = arith.constant 0 : index
    %c0_36 = arith.constant 0 : index
    %22 = vector.load %arg2[%c1_34, %c0_35, %c0_36] : memref<9x128x128xbf16, #tpu.memory_space<vmem>>, vector<1x128x128xbf16>
    %23 = vector.shape_cast %22 : vector<1x128x128xbf16> to vector<128x128xbf16>
    %cst_37 = arith.constant dense<0.000000e+00> : vector<256x128xf32>
    %24 = tpu.matmul %21, %23, %cst_37 {dimension_numbers = #tpu.dot_dimension_numbers<[1], [0], [0], [1], [0, 0, 1, 1], [], []>} : vector<256x128xbf16>, vector<128x128xbf16>, vector<256x128xf32> -> vector<256x128xf32>
    %25 = arith.addf %20, %24 : vector<256x128xf32>
    %c0_38 = arith.constant 0 : index
    %c0_39 = arith.constant 0 : index
    %26 = vector.load %arg7[%c0_38, %c0_39] : memref<256x128xf32, #tpu.memory_space<vmem>>, vector<256x128xf32>
    tpu.vector_store %arg7[%c0_38, %c0_39], %25 {strides = array<i32>} : memref<256x128xf32, #tpu.memory_space<vmem>>, vector<256x128xf32>,
    %c0_40 = arith.constant 0 : index
    %c0_41 = arith.constant 0 : index
    %c2 = arith.constant 2 : index
    %c0_42 = arith.constant 0 : index
    %27 = vector.load %arg8[%c0_40, %c0_41, %c2, %c0_42] : memref<1x18x18x128xf32, #tpu.memory_space<vmem>>, vector<1x16x16x128xf32>
    %28 = vector.shape_cast %27 : vector<1x16x16x128xf32> to vector<256x128xf32>
    %c0_43 = arith.constant 0 : index
    %c0_44 = arith.constant 0 : index
    %29 = vector.load %arg7[%c0_43, %c0_44] : memref<256x128xf32, #tpu.memory_space<vmem>>, vector<256x128xf32>
    %30 = arith.truncf %28 : vector<256x128xf32> to vector<256x128xbf16>
    %c2_45 = arith.constant 2 : index
    %c0_46 = arith.constant 0 : index
    %c0_47 = arith.constant 0 : index
    %31 = vector.load %arg2[%c2_45, %c0_46, %c0_47] : memref<9x128x128xbf16, #tpu.memory_space<vmem>>, vector<1x128x128xbf16>
    %32 = vector.shape_cast %31 : vector<1x128x128xbf16> to vector<128x128xbf16>
    %cst_48 = arith.constant dense<0.000000e+00> : vector<256x128xf32>
    %33 = tpu.matmul %30, %32, %cst_48 {dimension_numbers = #tpu.dot_dimension_numbers<[1], [0], [0], [1], [0, 0, 1, 1], [], []>} : vector<256x128xbf16>, vector<128x128xbf16>, vector<256x128xf32> -> vector<256x128xf32>
    %34 = arith.addf %29, %33 : vector<256x128xf32>
    %c0_49 = arith.constant 0 : index
    %c0_50 = arith.constant 0 : index
    %35 = vector.load %arg7[%c0_49, %c0_50] : memref<256x128xf32, #tpu.memory_space<vmem>>, vector<256x128xf32>
    tpu.vector_store %arg7[%c0_49, %c0_50], %34 {strides = array<i32>} : memref<256x128xf32, #tpu.memory_space<vmem>>, vector<256x128xf32>,
    %c0_51 = arith.constant 0 : index
    %c1_52 = arith.constant 1 : index
    %c0_53 = arith.constant 0 : index
    %c0_54 = arith.constant 0 : index
    %36 = vector.load %arg8[%c0_51, %c1_52, %c0_53, %c0_54] : memref<1x18x18x128xf32, #tpu.memory_space<vmem>>, vector<1x16x16x128xf32>
    %37 = vector.shape_cast %36 : vector<1x16x16x128xf32> to vector<256x128xf32>
    %c0_55 = arith.constant 0 : index
    %c0_56 = arith.constant 0 : index
    %38 = vector.load %arg7[%c0_55, %c0_56] : memref<256x128xf32, #tpu.memory_space<vmem>>, vector<256x128xf32>
    %39 = arith.truncf %37 : vector<256x128xf32> to vector<256x128xbf16>
    %c3 = arith.constant 3 : index
    %c0_57 = arith.constant 0 : index
    %c0_58 = arith.constant 0 : index
    %40 = vector.load %arg2[%c3, %c0_57, %c0_58] : memref<9x128x128xbf16, #tpu.memory_space<vmem>>, vector<1x128x128xbf16>
    %41 = vector.shape_cast %40 : vector<1x128x128xbf16> to vector<128x128xbf16>
    %cst_59 = arith.constant dense<0.000000e+00> : vector<256x128xf32>
    %42 = tpu.matmul %39, %41, %cst_59 {dimension_numbers = #tpu.dot_dimension_numbers<[1], [0], [0], [1], [0, 0, 1, 1], [], []>} : vector<256x128xbf16>, vector<128x128xbf16>, vector<256x128xf32> -> vector<256x128xf32>
    %43 = arith.addf %38, %42 : vector<256x128xf32>
    %c0_60 = arith.constant 0 : index
    %c0_61 = arith.constant 0 : index
    %44 = vector.load %arg7[%c0_60, %c0_61] : memref<256x128xf32, #tpu.memory_space<vmem>>, vector<256x128xf32>
    tpu.vector_store %arg7[%c0_60, %c0_61], %43 {strides = array<i32>} : memref<256x128xf32, #tpu.memory_space<vmem>>, vector<256x128xf32>,
    %c0_62 = arith.constant 0 : index
    %c1_63 = arith.constant 1 : index
    %c1_64 = arith.constant 1 : index
    %c0_65 = arith.constant 0 : index
    %45 = vector.load %arg8[%c0_62, %c1_63, %c1_64, %c0_65] : memref<1x18x18x128xf32, #tpu.memory_space<vmem>>, vector<1x16x16x128xf32>
    %46 = vector.shape_cast %45 : vector<1x16x16x128xf32> to vector<256x128xf32>
    %c0_66 = arith.constant 0 : index
    %c0_67 = arith.constant 0 : index
    %47 = vector.load %arg7[%c0_66, %c0_67] : memref<256x128xf32, #tpu.memory_space<vmem>>, vector<256x128xf32>
    %48 = arith.truncf %46 : vector<256x128xf32> to vector<256x128xbf16>
    %c4 = arith.constant 4 : index
    %c0_68 = arith.constant 0 : index
    %c0_69 = arith.constant 0 : index
    %49 = vector.load %arg2[%c4, %c0_68, %c0_69] : memref<9x128x128xbf16, #tpu.memory_space<vmem>>, vector<1x128x128xbf16>
    %50 = vector.shape_cast %49 : vector<1x128x128xbf16> to vector<128x128xbf16>
    %cst_70 = arith.constant dense<0.000000e+00> : vector<256x128xf32>
    %51 = tpu.matmul %48, %50, %cst_70 {dimension_numbers = #tpu.dot_dimension_numbers<[1], [0], [0], [1], [0, 0, 1, 1], [], []>} : vector<256x128xbf16>, vector<128x128xbf16>, vector<256x128xf32> -> vector<256x128xf32>
    %52 = arith.addf %47, %51 : vector<256x128xf32>
    %c0_71 = arith.constant 0 : index
    %c0_72 = arith.constant 0 : index
    %53 = vector.load %arg7[%c0_71, %c0_72] : memref<256x128xf32, #tpu.memory_space<vmem>>, vector<256x128xf32>
    tpu.vector_store %arg7[%c0_71, %c0_72], %52 {strides = array<i32>} : memref<256x128xf32, #tpu.memory_space<vmem>>, vector<256x128xf32>,
    %c0_73 = arith.constant 0 : index
    %c1_74 = arith.constant 1 : index
    %c2_75 = arith.constant 2 : index
    %c0_76 = arith.constant 0 : index
    %54 = vector.load %arg8[%c0_73, %c1_74, %c2_75, %c0_76] : memref<1x18x18x128xf32, #tpu.memory_space<vmem>>, vector<1x16x16x128xf32>
    %55 = vector.shape_cast %54 : vector<1x16x16x128xf32> to vector<256x128xf32>
    %c0_77 = arith.constant 0 : index
    %c0_78 = arith.constant 0 : index
    %56 = vector.load %arg7[%c0_77, %c0_78] : memref<256x128xf32, #tpu.memory_space<vmem>>, vector<256x128xf32>
    %57 = arith.truncf %55 : vector<256x128xf32> to vector<256x128xbf16>
    %c5 = arith.constant 5 : index
    %c0_79 = arith.constant 0 : index
    %c0_80 = arith.constant 0 : index
    %58 = vector.load %arg2[%c5, %c0_79, %c0_80] : memref<9x128x128xbf16, #tpu.memory_space<vmem>>, vector<1x128x128xbf16>
    %59 = vector.shape_cast %58 : vector<1x128x128xbf16> to vector<128x128xbf16>
    %cst_81 = arith.constant dense<0.000000e+00> : vector<256x128xf32>
    %60 = tpu.matmul %57, %59, %cst_81 {dimension_numbers = #tpu.dot_dimension_numbers<[1], [0], [0], [1], [0, 0, 1, 1], [], []>} : vector<256x128xbf16>, vector<128x128xbf16>, vector<256x128xf32> -> vector<256x128xf32>
    %61 = arith.addf %56, %60 : vector<256x128xf32>
    %c0_82 = arith.constant 0 : index
    %c0_83 = arith.constant 0 : index
    %62 = vector.load %arg7[%c0_82, %c0_83] : memref<256x128xf32, #tpu.memory_space<vmem>>, vector<256x128xf32>
    tpu.vector_store %arg7[%c0_82, %c0_83], %61 {strides = array<i32>} : memref<256x128xf32, #tpu.memory_space<vmem>>, vector<256x128xf32>,
    %c0_84 = arith.constant 0 : index
    %c2_85 = arith.constant 2 : index
    %c0_86 = arith.constant 0 : index
    %c0_87 = arith.constant 0 : index
    %63 = vector.load %arg8[%c0_84, %c2_85, %c0_86, %c0_87] : memref<1x18x18x128xf32, #tpu.memory_space<vmem>>, vector<1x16x16x128xf32>
    %64 = vector.shape_cast %63 : vector<1x16x16x128xf32> to vector<256x128xf32>
    %c0_88 = arith.constant 0 : index
    %c0_89 = arith.constant 0 : index
    %65 = vector.load %arg7[%c0_88, %c0_89] : memref<256x128xf32, #tpu.memory_space<vmem>>, vector<256x128xf32>
    %66 = arith.truncf %64 : vector<256x128xf32> to vector<256x128xbf16>
    %c6 = arith.constant 6 : index
    %c0_90 = arith.constant 0 : index
    %c0_91 = arith.constant 0 : index
    %67 = vector.load %arg2[%c6, %c0_90, %c0_91] : memref<9x128x128xbf16, #tpu.memory_space<vmem>>, vector<1x128x128xbf16>
    %68 = vector.shape_cast %67 : vector<1x128x128xbf16> to vector<128x128xbf16>
    %cst_92 = arith.constant dense<0.000000e+00> : vector<256x128xf32>
    %69 = tpu.matmul %66, %68, %cst_92 {dimension_numbers = #tpu.dot_dimension_numbers<[1], [0], [0], [1], [0, 0, 1, 1], [], []>} : vector<256x128xbf16>, vector<128x128xbf16>, vector<256x128xf32> -> vector<256x128xf32>
    %70 = arith.addf %65, %69 : vector<256x128xf32>
    %c0_93 = arith.constant 0 : index
    %c0_94 = arith.constant 0 : index
    %71 = vector.load %arg7[%c0_93, %c0_94] : memref<256x128xf32, #tpu.memory_space<vmem>>, vector<256x128xf32>
    tpu.vector_store %arg7[%c0_93, %c0_94], %70 {strides = array<i32>} : memref<256x128xf32, #tpu.memory_space<vmem>>, vector<256x128xf32>,
    %c0_95 = arith.constant 0 : index
    %c2_96 = arith.constant 2 : index
    %c1_97 = arith.constant 1 : index
    %c0_98 = arith.constant 0 : index
    %72 = vector.load %arg8[%c0_95, %c2_96, %c1_97, %c0_98] : memref<1x18x18x128xf32, #tpu.memory_space<vmem>>, vector<1x16x16x128xf32>
    %73 = vector.shape_cast %72 : vector<1x16x16x128xf32> to vector<256x128xf32>
    %c0_99 = arith.constant 0 : index
    %c0_100 = arith.constant 0 : index
    %74 = vector.load %arg7[%c0_99, %c0_100] : memref<256x128xf32, #tpu.memory_space<vmem>>, vector<256x128xf32>
    %75 = arith.truncf %73 : vector<256x128xf32> to vector<256x128xbf16>
    %c7 = arith.constant 7 : index
    %c0_101 = arith.constant 0 : index
    %c0_102 = arith.constant 0 : index
    %76 = vector.load %arg2[%c7, %c0_101, %c0_102] : memref<9x128x128xbf16, #tpu.memory_space<vmem>>, vector<1x128x128xbf16>
    %77 = vector.shape_cast %76 : vector<1x128x128xbf16> to vector<128x128xbf16>
    %cst_103 = arith.constant dense<0.000000e+00> : vector<256x128xf32>
    %78 = tpu.matmul %75, %77, %cst_103 {dimension_numbers = #tpu.dot_dimension_numbers<[1], [0], [0], [1], [0, 0, 1, 1], [], []>} : vector<256x128xbf16>, vector<128x128xbf16>, vector<256x128xf32> -> vector<256x128xf32>
    %79 = arith.addf %74, %78 : vector<256x128xf32>
    %c0_104 = arith.constant 0 : index
    %c0_105 = arith.constant 0 : index
    %80 = vector.load %arg7[%c0_104, %c0_105] : memref<256x128xf32, #tpu.memory_space<vmem>>, vector<256x128xf32>
    tpu.vector_store %arg7[%c0_104, %c0_105], %79 {strides = array<i32>} : memref<256x128xf32, #tpu.memory_space<vmem>>, vector<256x128xf32>,
    %c0_106 = arith.constant 0 : index
    %c2_107 = arith.constant 2 : index
    %c2_108 = arith.constant 2 : index
    %c0_109 = arith.constant 0 : index
    %81 = vector.load %arg8[%c0_106, %c2_107, %c2_108, %c0_109] : memref<1x18x18x128xf32, #tpu.memory_space<vmem>>, vector<1x16x16x128xf32>
    %82 = vector.shape_cast %81 : vector<1x16x16x128xf32> to vector<256x128xf32>
    %c0_110 = arith.constant 0 : index
    %c0_111 = arith.constant 0 : index
    %83 = vector.load %arg7[%c0_110, %c0_111] : memref<256x128xf32, #tpu.memory_space<vmem>>, vector<256x128xf32>
    %84 = arith.truncf %82 : vector<256x128xf32> to vector<256x128xbf16>
    %c8 = arith.constant 8 : index
    %c0_112 = arith.constant 0 : index
    %c0_113 = arith.constant 0 : index
    %85 = vector.load %arg2[%c8, %c0_112, %c0_113] : memref<9x128x128xbf16, #tpu.memory_space<vmem>>, vector<1x128x128xbf16>
    %86 = vector.shape_cast %85 : vector<1x128x128xbf16> to vector<128x128xbf16>
    %cst_114 = arith.constant dense<0.000000e+00> : vector<256x128xf32>
    %87 = tpu.matmul %84, %86, %cst_114 {dimension_numbers = #tpu.dot_dimension_numbers<[1], [0], [0], [1], [0, 0, 1, 1], [], []>} : vector<256x128xbf16>, vector<128x128xbf16>, vector<256x128xf32> -> vector<256x128xf32>
    %88 = arith.addf %83, %87 : vector<256x128xf32>
    %c0_115 = arith.constant 0 : index
    %c0_116 = arith.constant 0 : index
    %89 = vector.load %arg7[%c0_115, %c0_116] : memref<256x128xf32, #tpu.memory_space<vmem>>, vector<256x128xf32>
    tpu.vector_store %arg7[%c0_115, %c0_116], %88 {strides = array<i32>} : memref<256x128xf32, #tpu.memory_space<vmem>>, vector<256x128xf32>,
    %c0_117 = arith.constant 0 : index
    %c0_118 = arith.constant 0 : index
    %90 = vector.load %arg7[%c0_117, %c0_118] : memref<256x128xf32, #tpu.memory_space<vmem>>, vector<256x128xf32>
    %c0_119 = arith.constant 0 : index
    %c0_120 = arith.constant 0 : index
    %91 = vector.load %arg3[%c0_119, %c0_120] : memref<1x128xf32, #tpu.memory_space<vmem>>, vector<1x128xf32>
    %92 = vector.broadcast %91 : vector<1x128xf32> to vector<256x128xf32>
    %93 = arith.mulf %90, %92 : vector<256x128xf32>
    %c0_121 = arith.constant 0 : index
    %c0_122 = arith.constant 0 : index
    %94 = vector.load %arg4[%c0_121, %c0_122] : memref<1x128xf32, #tpu.memory_space<vmem>>, vector<1x128xf32>
    %95 = vector.broadcast %94 : vector<1x128xf32> to vector<256x128xf32>
    %96 = arith.addf %93, %95 : vector<256x128xf32>
    %c0_123 = arith.constant 0 : index
    %c0_124 = arith.constant 0 : index
    %97 = vector.load %arg6[%c0_123, %c0_124] : memref<256x128xf32, #tpu.memory_space<vmem>>, vector<256x128xf32>
    %98 = arith.addf %97, %96 : vector<256x128xf32>
    %c0_125 = arith.constant 0 : index
    %c0_126 = arith.constant 0 : index
    %99 = vector.load %arg6[%c0_125, %c0_126] : memref<256x128xf32, #tpu.memory_space<vmem>>, vector<256x128xf32>
    tpu.vector_store %arg6[%c0_125, %c0_126], %98 {strides = array<i32>} : memref<256x128xf32, #tpu.memory_space<vmem>>, vector<256x128xf32>,
    %c0_127 = arith.constant 0 : index
    %c0_128 = arith.constant 0 : index
    %100 = vector.load %arg6[%c0_127, %c0_128] : memref<256x128xf32, #tpu.memory_space<vmem>>, vector<256x128xf32>
    %101 = vector.shape_cast %100 : vector<256x128xf32> to vector<1x16x16x128xf32>
    %102 = arith.truncf %101 : vector<1x16x16x128xf32> to vector<1x16x16x128xbf16>
    %c0_129 = arith.constant 0 : index
    %c0_130 = arith.constant 0 : index
    %c0_131 = arith.constant 0 : index
    %c0_132 = arith.constant 0 : index
    %103 = vector.load %arg5[%c0_129, %c0_130, %c0_131, %c0_132] : memref<1x16x16x128xbf16, #tpu.memory_space<vmem>>, vector<1x16x16x128xbf16>
    tpu.vector_store %arg5[%c0_129, %c0_130, %c0_131, %c0_132], %102 {strides = array<i32>} : memref<1x16x16x128xbf16, #tpu.memory_space<vmem>>, vector<1x16x16x128xbf16>,
    return
  }
  func.func @transform_0(%arg0: i32) -> (i32, i32, i32, i32) {
    %c0_i32 = arith.constant 0 : i32
    %c0_i32_0 = arith.constant 0 : i32
    %c0_i32_1 = arith.constant 0 : i32
    %c0_i32_2 = arith.constant 0 : i32
    return %arg0, %c0_i32, %c0_i32_0, %c0_i32_1 : i32, i32, i32, i32
  }
  func.func @transform_1(%arg0: i32) -> (i32, i32, i32) {
    %c0_i32 = arith.constant 0 : i32
    %c0_i32_0 = arith.constant 0 : i32
    %c0_i32_1 = arith.constant 0 : i32
    %c0_i32_2 = arith.constant 0 : i32
    return %c0_i32, %c0_i32_0, %c0_i32_1 : i32, i32, i32
  }
  func.func @transform_2(%arg0: i32) -> (i32, i32) {
    %c0_i32 = arith.constant 0 : i32
    %c0_i32_0 = arith.constant 0 : i32
    %c0_i32_1 = arith.constant 0 : i32
    return %c0_i32, %c0_i32_0 : i32, i32
  }
  func.func @transform_3(%arg0: i32) -> (i32, i32) {
    %c0_i32 = arith.constant 0 : i32
    %c0_i32_0 = arith.constant 0 : i32
    %c0_i32_1 = arith.constant 0 : i32
    return %c0_i32, %c0_i32_0 : i32, i32
  }
  func.func @transform_4(%arg0: i32) -> (i32, i32, i32, i32) {
    %c0_i32 = arith.constant 0 : i32
    %c0_i32_0 = arith.constant 0 : i32
    %c0_i32_1 = arith.constant 0 : i32
    %c0_i32_2 = arith.constant 0 : i32
    return %arg0, %c0_i32, %c0_i32_0, %c0_i32_1 : i32, i32, i32, i32
  }
}

</mosaic_0001>

<bundles_post_ra>
// kernel: tpu_custom_call.1
= control target key start
LH: loop header
LB: loop body
LE: loop exit
PB: predicated region body
PF: predicated region fallthrough
CT: control target
= control target key end

     0   :  { %9 = vsyncpa [#allocation6], 0  ;;  %s6513_s0 = inlined_call_operand.hbm [shape: bf16[2,16,16,128], index: 0, kind: input, shape index: {}]   ;;  %s6514_s1 = inlined_call_operand.hbm [shape: bf16[9,128,128], index: 1, kind: input, shape index: {}]   ;;  %s6515_s2 = inlined_call_operand.vmem [shape: f32[1,128], index: 2, kind: input, shape index: {}]   ;;  %s6516_s3 = inlined_call_operand.vmem [shape: f32[1,128], index: 3, kind: input, shape index: {}]   ;;  %s6517_s4 = inlined_call_operand.hbm [shape: bf16[2,16,16,128], index: 4, kind: output, shape index: {}]  }
   0x1   :  { %11 = vsyncpa [#allocation6 + $0x1], 0 }
   0x2   :  { %12 = vsyncpa [#allocation9], 0 }
   0x3   :  { %13 = vsyncpa [#allocation7], 0 }
   0x4   :  { %15 = vsyncpa [#allocation7 + $0x1], 0  ;;  %s5575_s15 = smov 0   ;;  %s5577_s16 = smov 0  }
   0x5   :  { %s5579_s17 = smov 0   ;;  %s5581_s18 = smov 0  }
   0x6 LB: > { %s5596_s19 = sadd.s32 4294967295, %s5539_s18   ;;  %s4272_s20 = sadd.s32 4294967294, %s5539_s18   ;;  %s5539_s18 = sphi %s5581_s18, %s6567_s18   ;;  %s5535_s17 = sphi %s5579_s17, %s6566_s17   ;;  %s5531_s16 = sphi %s5577_s16, %s6565_s16   ;;  %s5527_s15 = sphi %s5575_s15, %s6564_s15  }
   0x7   : > { %p41_p0 = scmp.ne.s32.totalorder %s5531_s16, %s5527_s15  ;;  %p6518_p1 = scmp.eq.s32.totalorder %s5596_s19, 0 }
   0x8   : > { %p134_p3 = scmp.eq.s32.totalorder %s4272_s20, 1  ;;  %p4273_p5 = scmp.ge.s32.totalorder %s5539_s18, 1 }
   0x9   : > { %p5605_p4 = por %p6518_p1, %p41_p0  ;;  %p141_p7 = scmp.lt.s32.totalorder %s5539_s18, 3 }
   0xa   : > { %p5610_p6 = por %p134_p3, %p41_p0  ;;  %s5541_s24 = smov [#allocation8]  }
   0xb   : > { %s6522_s21 = scalar_select %p5605_p4, 1, 0 }
   0xc   : > { %s6523_s22 = scalar_select %p5610_p6, 1, 0 }
   0xd   : > { %p5615_p8 = pnand %p4273_p5, %p141_p7  ;;  %s153_s25 = sshll.u32 %s5541_s24, 4  ;;  %s154_s25 = int_to_ptr.vmem [resolvable:$true] %s153_s25 }
   0xe   : > { %s5629_s27 = sadd.s32 1, %s5539_s18   ;;  %s28_s28 = sadd.s32 1, %s5535_s17 }
   0xf   : > { %s6524_s23 = scalar_select %p5615_p8, 1, 0 }
  0x10   : > { %p5274_p9 = pneg %p5615_p8  ;;  %s25_s29 = ssub.s32 %s5539_s18, %s5629_s27 }
  0x11   : > { %s5428_s30 = scalar_lea.vmem %s154_s25, 9216  ;;  %p5436_p5 = scmp.lt.s32.totalorder %s154_s25, %s154_s25 }
  0x12   : > { %p5624_p11 = pnand %p5274_p9, %p6518_p1  ;;  %p5429_p13 = scmp.ne.s32.totalorder %s154_s25, %s5428_s30 }
  0x13   : > { %p5437_p7 = scmp.lt.s32.totalorder %s5428_s30, %s5428_s30 }
  0x14   : > { %p5419_p12 = pneg %p5624_p11 }
  0x15   : > { %p5438_p10 = por %p5437_p7, %p5436_p5 }
  0x16   : > { %p5431_p0 = pnand %p5429_p13, %p5419_p12 }
  0x18   : > { %p5432_p3 = pneg %p5431_p0 }
  0x1a   : > { %p5439_p2 = pnand %p5438_p10, %p5432_p3 }
  0x1c   : > { %5442 = shalt.err (!%p5439_p2)
}
  0x1d   : > { %s5542_s5 = smov 64   ;;  %s5543_s6 = smov 4  }
  0x1e   : > { %5277 = dma.hbm_to_vmem [thread:$0]  (!%p5624_p11), %s6514_s1, 9216, %s154_s25, [#allocation9], %s5542_s5, %s5542_s5, %s5543_s6  }
  0x1f   : > { %p26_p2 = scmp.eq.s32.totalorder %s25_s29, 0  ;;  %p35_p9 = scmp.ne.s32.totalorder %s5535_s17, %s5531_s16 }
  0x20   : > { %p36_p10 = scmp.eq.s32.totalorder %s5539_s18, 0  ;;  %p5287_p12 = scmp.lt.s32.totalorder %s5539_s18, 2 }
  0x21   : > { %s5649_s9 = scalar_select %p26_p2, %s5535_s17, %s28_s28  }
  0x22   : > { %p37_p13 = por %p36_p10, %p35_p9  ;;  %p6526_p0 = scmp.eq.s32.totalorder %s5596_s19, 1 }
  0x23   : > { %s173_s11 = sand.u32 1, %s5535_s17   ;;  %s4394_s12 = sshll.u32 %s5539_s18, 11 }
  0x24   : > { %p5653_p3 = por %p6526_p0, %p35_p9  ;;  %s4276_s13 = sshll.u32 %s173_s11, 7 }
  0x25   : > { %s5662_s24 = scalar_lea.hbm %s6513_s0, %s4394_s12  ;;  %s177_s25 = scalar_lea.vmem [#allocation5], %s4276_s13 }
  0x26   : > { %s6527_s10 = scalar_select %p5653_p3, 1, 0 }
  0x27   : > { %s184_s26 = sshll.u32 %s177_s25, 4  ;;  %p5664_p11 = pnand %p5287_p12, %p37_p13  ;;  %s5668_s26 = int_to_ptr.vmem [resolvable:$true] %s184_s26 }
  0x28   : > { %s5670_s29 = scalar_lea.sflag [#allocation6], %s173_s11  ;;  %s5443_s30 = scalar_lea.hbm %s5662_s24, 2048 }
  0x29   : > { %p5444_p5 = scmp.ne.s32.totalorder %s5662_s24, %s5443_s30  ;;  %p5445_p7 = pneg %p5664_p11 }
  0x2a   : > { %s5448_s12 = scalar_lea.hbm %s6513_s0, 4096  ;;  %p5449_p10 = scmp.lt.s32.totalorder %s5662_s24, %s6513_s0 }
  0x2b   : > { %p5446_p2 = pnand %p5445_p7, %p5444_p5  ;;  %p5450_p12 = scmp.lt.s32.totalorder %s5448_s12, %s5443_s30 }
  0x2d   : > { %p5447_p9 = pneg %p5446_p2  ;;  %p5451_p13 = por %p5450_p12, %p5449_p10 }
  0x2f   : > { %p5452_p0 = pnand %p5451_p13, %p5447_p9 }
  0x31   : > { %5455 = shalt.err (!%p5452_p0)
}
  0x32   : > { %s5456_s11 = scalar_lea.vmem %s5668_s26, 2048  ;;  %s5544_s20 = smov [#allocation5]  }
  0x33   : > { %p5457_p1 = scmp.ne.s32.totalorder %s5668_s26, %s5456_s11  ;;  %s5461_s25 = sshll.u32 %s5544_s20, 4  ;;  %s5462_s25 = int_to_ptr.vmem [resolvable:$false] %s5461_s25 }
  0x34   : > { %s5463_s7 = scalar_lea.vmem %s5462_s25, 4096  ;;  %p5464_p2 = scmp.lt.s32.totalorder %s5668_s26, %s5462_s25 }
  0x35   : > { %p5459_p6 = pnand %p5457_p1, %p5445_p7  ;;  %p5465_p3 = scmp.lt.s32.totalorder %s5463_s7, %s5456_s11 }
  0x37   : > { %p5460_p5 = pneg %p5459_p6  ;;  %p5466_p4 = por %p5465_p3, %p5464_p2 }
  0x39   : > { %p5467_p8 = pnand %p5466_p4, %p5460_p5 }
  0x3b   : > { %5470 = shalt.err (!%p5467_p8)
}
  0x3c   : > { %5281 = dma.hbm_to_vmem [thread:$0]  (!%p5664_p11), %s5662_s24, 2048, %s5668_s26, %s5670_s29, %s5542_s5, %s5542_s5, %s5543_s6  }
  0x3d   : > { %p6529_p1 = scmp.ne.s32.totalorder %s6524_s23, 0 }
  0x3f   : > { %196 = sbr.rel (%p6529_p1) target bundleno = 619 (0x26b), region = 36 }
  0x44   : > { %s5697_s30 = sand.u32 1, %s5531_s16   ;;  %p6530_p4 = scmp.ne.s32.totalorder %s6522_s21, 0 }
  0x45   : > { %s4280_s8 = sshll.u32 %s5697_s30, 7  ;;  %s199_s12 = scalar_lea.sflag [#allocation6], %s5697_s30 }
  0x46   : > { %s5703_s28 = scalar_lea.vmem [#allocation5], %s4280_s8 }
  0x47   : > { %5514 = dma.done.wait (%p6530_p4), %s199_s12, 2048  }
  0x48   : > { %5516 = vsyncadd (%p6530_p4), %s199_s12, 4294965248  ;;  %p6531_p6 = scmp.eq.s32.totalorder %s5596_s19, 0 }
  0x4a   : > { %5518 = dma.done.wait (%p6531_p6), [#allocation9], 9216   ;;  %p6532_p8 = pmov %p6531_p6 }
  0x4b   : > { %v5545_v0 = vmov 0.0   ;;  %v5546_v1 = vmov 0.0|0.0   ;;  %v5328_v2 = vld [vmem:[#allocation8 + $0x38] sm:$0xff]   ;;  %v5329_v3 = vld [vmem:[#allocation8 + $0x30] sm:$0xff]   ;;  %v5330_v4 = vld [vmem:[#allocation8 + $0x28] sm:$0xff]   ;;  %s6343_s24 = scalar_lea.vmem [#allocation10], %s4280_s8 }
  0x4c   : > { %5520 = vsyncadd (%p6532_p8), [#allocation9], 4294958080  ;;  %264 = vst [vmem:[#allocation4] sm:$0xff] %v5545_v0  ;;  %4834 = vmatprep.mubr.bf16.mxu0 %v5546_v1  ;;  %4818 = vmatprep.subr.bf16.mxu0 %v5328_v2  ;;  %v5331_v5 = vld [vmem:[#allocation8 + $0x20] sm:$0xff]   ;;  %v4578_v6 = vld [vmem:[%s5703_s28 + $0x38] sm:$0xff]   ;;  %s4427_s26 = sshll.u32 %s5596_s19, 11 }
  0x4d   : > { %265 = vst [vmem:[#allocation4 + $0x8] sm:$0xff] %v5545_v0  ;;  %266 = vst [vmem:[#allocation4 + $0x10] sm:$0x3] %v5545_v0  ;;  %5250 = vmatprep.subr.bf16.mxu1 %v5328_v2  ;;  %4819 = vmatpush3.bf16.msra.mxu0 %v5328_v2  ;;  %v4429_v7 = vld [vmem:[%s5703_s28] sm:$0xff]   ;;  %v4458_v9 = vunpack.c.l.bf16 %v4578_v6  ;;  %v4459_v10 = vunpack.c.h.bf16 %v4578_v6  ;;  %v5332_v15 = vld [vmem:[#allocation8 + $0x18] sm:$0xff]   ;;  %s4189_s29 = sshll.u32 %s6343_s24, 4  ;;  %s6466_s11 = scalar_lea.hbm %s6517_s4, %s4427_s26  ;;  %s6468_s29 = int_to_ptr.vmem [resolvable:$true] %s4189_s29 }
  0x4e   : > { %267 = vst [vmem:[#allocation4 + $0x18] sm:$0xff] %v5545_v0  ;;  %268 = vst [vmem:[#allocation4 + $0x20] sm:$0xff] %v5545_v0  ;;  %5258 = vmatpush3.bf16.msra.mxu1 %v5328_v2  ;;  %4820 = vmatprep.subr.bf16.mxu0 %v5329_v3  ;;  %v4579_v8 = vld [vmem:[%s5703_s28 + $0x40] sm:$0xff]   ;;  %v4430_v11 = vunpack.c.l.bf16 %v4429_v7  ;;  %v4431_v12 = vunpack.c.h.bf16 %v4429_v7  ;;  %v4572_v16 = vld [vmem:[%s5703_s28 + $0x8] sm:$0xff]   ;;  %s4176_s19 = scalar_lea.sflag [#allocation7], %s5697_s30  ;;  %s5471_s20 = scalar_lea.vmem %s6468_s29, 2048 }
  0x4f   : > { %269 = vst [vmem:[#allocation4 + $0x28] sm:$0x3] %v5545_v0  ;;  %270 = vst [vmem:[#allocation4 + $0x30] sm:$0xff] %v5545_v0  ;;  %5251 = vmatprep.subr.bf16.mxu1 %v5329_v3  ;;  %v4462_v13 = vunpack.c.l.bf16 %v4579_v8  ;;  %v4463_v14 = vunpack.c.h.bf16 %v4579_v8  ;;  %v4580_v17 = vld [vmem:[%s5703_s28 + $0x48] sm:$0xff]   ;;  %v4573_v18 = vld [vmem:[%s5703_s28 + $0x10] sm:$0xff]   ;;  %v4434_v19 = vunpack.c.l.bf16 %v4572_v16  ;;  %v4435_v20 = vunpack.c.h.bf16 %v4572_v16  ;;  %p5472_p3 = scmp.ne.s32.totalorder %s6468_s29, %s5471_s20  ;;  %p6561_p11 = scmp.ne.s32.totalorder %s6527_s10, 0 }
  0x50   : > { %271 = vst [vmem:[#allocation4 + $0x38] sm:$0xff] %v5545_v0  ;;  %272 = vst [vmem:[#allocation4 + $0x40] sm:$0x3] %v5545_v0  ;;  %v4466_v21 = vunpack.c.l.bf16 %v4580_v17  ;;  %v4467_v22 = vunpack.c.h.bf16 %v4580_v17  ;;  %v4581_v23 = vld [vmem:[%s5703_s28 + $0x50] sm:$0xff]   ;;  %v4438_v24 = vunpack.c.l.bf16 %v4573_v18  ;;  %v4439_v25 = vunpack.c.h.bf16 %v4573_v18  ;;  %v5334_v32 = vld [vmem:[#allocation8 + $0x8] sm:$0xff]   ;;  %s5547_s25 = smov [#allocation10]  }
  0x51   : > { %273 = vst [vmem:[#allocation4 + $0x48] sm:$0xff] %v5545_v0  ;;  %274 = vst [vmem:[#allocation4 + $0x50] sm:$0xff] %v5545_v0  ;;  %4821 = vmatpush3.bf16.msra.mxu0 %v5329_v3  ;;  %v4470_v26 = vunpack.c.l.bf16 %v4581_v23  ;;  %v4471_v27 = vunpack.c.h.bf16 %v4581_v23  ;;  %v5333_v28 = vld [vmem:[#allocation8 + $0x10] sm:$0xff]   ;;  %v4574_v33 = vld [vmem:[%s5703_s28 + $0x18] sm:$0xff]   ;;  %p5473_p7 = pnand %p5472_p3, %p6561_p11  ;;  %s5475_s7 = sshll.u32 %s5547_s25, 4  ;;  %s5476_s7 = int_to_ptr.vmem [resolvable:$false] %s5475_s7 }
  0x52   : > { %275 = vst [vmem:[#allocation4 + $0x58] sm:$0x3] %v5545_v0  ;;  %276 = vst [vmem:[#allocation4 + $0x60] sm:$0xff] %v5545_v0  ;;  %5259 = vmatpush3.bf16.msra.mxu1 %v5329_v3  ;;  %4822 = vmatprep.subr.bf16.mxu0 %v5330_v4  ;;  %v4582_v34 = vld [vmem:[%s5703_s28 + $0x58] sm:$0xff]   ;;  %v4442_v35 = vunpack.c.l.bf16 %v4574_v33  ;;  %v4443_v36 = vunpack.c.h.bf16 %v4574_v33  ;;  %v4575_v39 = vld [vmem:[%s5703_s28 + $0x20] sm:$0xff]   ;;  %s5477_s8 = scalar_lea.vmem %s5476_s7, 4096  ;;  %p5478_p10 = scmp.lt.s32.totalorder %s6468_s29, %s5476_s7 }
  0x53   : > { %277 = vst [vmem:[#allocation4 + $0x68] sm:$0xff] %v5545_v0  ;;  %278 = vst [vmem:[#allocation4 + $0x70] sm:$0x3] %v5545_v0  ;;  %5252 = vmatprep.subr.bf16.mxu1 %v5330_v4  ;;  %v4474_v37 = vunpack.c.l.bf16 %v4582_v34  ;;  %v4475_v38 = vunpack.c.h.bf16 %v4582_v34  ;;  %v4583_v40 = vld [vmem:[%s5703_s28 + $0x60] sm:$0xff]   ;;  %v4446_v41 = vunpack.c.l.bf16 %v4575_v39  ;;  %v4447_v42 = vunpack.c.h.bf16 %v4575_v39  ;;  %v5336_v50 = vld [vmem:[#allocation8 + $0x78] sm:$0xff]   ;;  %p5474_p9 = pneg %p5473_p7  ;;  %p5479_p12 = scmp.lt.s32.totalorder %s5477_s8, %s5471_s20 }
  0x54   : > { %279 = vst [vmem:[#allocation4 + $0x78] sm:$0xff] %v5545_v0  ;;  %280 = vst [vmem:[#allocation4 + $0x80] sm:$0xff] %v5545_v0  ;;  %v4478_v43 = vunpack.c.l.bf16 %v4583_v40  ;;  %v4479_v44 = vunpack.c.h.bf16 %v4583_v40  ;;  %v5335_v45 = vld [vmem:[#allocation8] sm:$0xff]   ;;  %v5337_v51 = vld [vmem:[#allocation8 + $0xb8] sm:$0xff]  }
  0x55   : > { %281 = vst [vmem:[#allocation4 + $0x88] sm:$0x3] %v5545_v0  ;;  %282 = vst [vmem:[#allocation4 + $0x90] sm:$0xff] %v5545_v0  ;;  %4823 = vmatpush3.bf16.msra.mxu0 %v5330_v4  ;;  %v4576_v55 = vld [vmem:[%s5703_s28 + $0x28] sm:$0xff]   ;;  %v4577_v61 = vld [vmem:[%s5703_s28 + $0x30] sm:$0xff]   ;;  %p5480_p13 = por %p5479_p12, %p5478_p10 }
  0x56   : > { %283 = vst [vmem:[#allocation4 + $0x98] sm:$0xff] %v5545_v0  ;;  %284 = vst [vmem:[#allocation4 + $0xa0] sm:$0x3] %v5545_v0  ;;  %5260 = vmatpush3.bf16.msra.mxu1 %v5330_v4  ;;  %4824 = vmatprep.subr.bf16.mxu0 %v5331_v5  ;;  %v4584_v56 = vld [vmem:[%s5703_s28 + $0x68] sm:$0xff]   ;;  %v4450_v57 = vunpack.c.l.bf16 %v4576_v55  ;;  %v4451_v58 = vunpack.c.h.bf16 %v4576_v55  ;;  %v4585_v62 = vld [vmem:[%s5703_s28 + $0x70] sm:$0xff]   ;;  %v4454_v2 = vunpack.c.l.bf16 %v4577_v61  ;;  %v4455_v3 = vunpack.c.h.bf16 %v4577_v61 }
  0x57   : > { %285 = vst [vmem:[#allocation4 + $0xa8] sm:$0xff] %v5545_v0  ;;  %286 = vst [vmem:[#allocation4 + $0xb0] sm:$0xff] %v5545_v0  ;;  %5253 = vmatprep.subr.bf16.mxu1 %v5331_v5  ;;  %v4482_v59 = vunpack.c.l.bf16 %v4584_v56  ;;  %v4483_v60 = vunpack.c.h.bf16 %v4584_v56  ;;  %v4486_v4 = vunpack.c.l.bf16 %v4585_v62  ;;  %v5338_v6 = vld [vmem:[#allocation8 + $0x70] sm:$0xff]   ;;  %v5343_v23 = vld [vmem:[#allocation8 + $0xa0] sm:$0xff]   ;;  %p5481_p0 = pnand %p5480_p13, %p5474_p9 }
  0x58   : > { %287 = vst [vmem:[#allocation4 + $0xb8] sm:$0x3] %v5545_v0  ;;  %288 = vst [vmem:[#allocation4 + $0xc0] sm:$0xff] %v5545_v0  ;;  %v5339_v7 = vld [vmem:[#allocation8 + $0xb0] sm:$0xff]   ;;  %v1187_v56 = vld [vmem:[#allocation4 + $0xa] sm:$0xff] }
  0x59   : > { %289 = vst [vmem:[#allocation4 + $0xc8] sm:$0xff] %v5545_v0  ;;  %290 = vst [vmem:[#allocation4 + $0xd0] sm:$0x3] %v5545_v0  ;;  %4825 = vmatpush3.bf16.msra.mxu0 %v5331_v5  ;;  %v5346_v39 = vld [vmem:[#allocation8 + $0x50] sm:$0xff]  }
  0x5a   : > { %291 = vst [vmem:[#allocation4 + $0xd8] sm:$0xff] %v5545_v0  ;;  %292 = vst [vmem:[#allocation4 + $0xe0] sm:$0xff] %v5545_v0  ;;  %5261 = vmatpush3.bf16.msra.mxu1 %v5331_v5  ;;  %4826 = vmatprep.subr.bf16.mxu0 %v5332_v15  ;;  %v4487_v5 = vunpack.c.h.bf16 %v4585_v62  ;;  %v5347_v40 = vld [vmem:[#allocation8 + $0x90] sm:$0xff]  }
  0x5b   : > { %293 = vst [vmem:[#allocation4 + $0xe8] sm:$0x3] %v5545_v0  ;;  %294 = vst [vmem:[#allocation4 + $0xf0] sm:$0xff] %v5545_v0  ;;  %5254 = vmatprep.subr.bf16.mxu1 %v5332_v15 }
  0x5c   : > { %295 = vst [vmem:[#allocation4 + $0xf8] sm:$0xff] %v5545_v0  ;;  %296 = vst [vmem:[#allocation4 + $0x100] sm:$0x3] %v5545_v0 }
  0x5d   : > { %297 = vst [vmem:[#allocation4 + $0x108] sm:$0xff] %v5545_v0  ;;  %298 = vst [vmem:[#allocation4 + $0x110] sm:$0xff] %v5545_v0  ;;  %4827 = vmatpush3.bf16.msra.mxu0 %v5332_v15 }
  0x5e   : > { %299 = vst [vmem:[#allocation4 + $0x118] sm:$0x3] %v5545_v0  ;;  %300 = vst [vmem:[#allocation4 + $0x120] sm:$0xff] %v5545_v0  ;;  %5262 = vmatpush3.bf16.msra.mxu1 %v5332_v15  ;;  %4828 = vmatprep.subr.bf16.mxu0 %v5333_v28  ;;  %v5341_v15 = vld [vmem:[#allocation8 + $0xa8] sm:$0xff]  }
  0x5f   : > { %301 = vst [vmem:[#allocation4 + $0x128] sm:$0xff] %v5545_v0  ;;  %302 = vst [vmem:[#allocation4 + $0x130] sm:$0x3] %v5545_v0  ;;  %5255 = vmatprep.subr.bf16.mxu1 %v5333_v28 }
  0x60   : > { %303 = vst [vmem:[#allocation4 + $0x138] sm:$0xff] %v5545_v0  ;;  %304 = vst [vmem:[#allocation4 + $0x140] sm:$0xff] %v5545_v0 }
  0x61   : > { %305 = vst [vmem:[#allocation4 + $0x148] sm:$0x3] %v5545_v0  ;;  %306 = vst [vmem:[#allocation4 + $0x150] sm:$0xff] %v5545_v0  ;;  %4829 = vmatpush3.bf16.msra.mxu0 %v5333_v28 }
  0x62   : > { %307 = vst [vmem:[#allocation4 + $0x158] sm:$0xff] %v5545_v0  ;;  %308 = vst [vmem:[#allocation4 + $0x160] sm:$0x3] %v5545_v0  ;;  %5263 = vmatpush3.bf16.msra.mxu1 %v5333_v28  ;;  %4830 = vmatprep.subr.bf16.mxu0 %v5334_v32 }
  0x63   : > { %309 = vst [vmem:[#allocation4 + $0x168] sm:$0xff] %v5545_v0  ;;  %310 = vst [vmem:[#allocation4 + $0x170] sm:$0xff] %v5545_v0  ;;  %5256 = vmatprep.subr.bf16.mxu1 %v5334_v32 }
  0x64   : > { %311 = vst [vmem:[#allocation4 + $0x178] sm:$0x3] %v5545_v0  ;;  %312 = vst [vmem:[#allocation4 + $0x180] sm:$0xff] %v5545_v0 }
  0x65   : > { %313 = vst [vmem:[#allocation4 + $0x188] sm:$0xff] %v5545_v0  ;;  %314 = vst [vmem:[#allocation4 + $0x190] sm:$0x3] %v5545_v0  ;;  %4831 = vmatpush3.bf16.msra.mxu0 %v5334_v32 }
  0x66   : > { %315 = vst [vmem:[#allocation4 + $0x198] sm:$0xff] %v5545_v0  ;;  %316 = vst [vmem:[#allocation4 + $0x1a0] sm:$0xff] %v5545_v0  ;;  %5264 = vmatpush3.bf16.msra.mxu1 %v5334_v32  ;;  %4832 = vmatprep.subr.bf16.mxu0 %v5335_v45  ;;  %v5345_v32 = vld [vmem:[#allocation8 + $0x98] sm:$0xff]  }
  0x67   : > { %317 = vst [vmem:[#allocation4 + $0x1a8] sm:$0x3] %v5545_v0  ;;  %397 = vst [vmem:[#allocation4 + $0xc1] sm:$0xff] %v4458_v9  ;;  %5257 = vmatprep.subr.bf16.mxu1 %v5335_v45 }
  0x68   : > { %398 = vst [vmem:[#allocation4 + $0xc9] sm:$0xff] %v4459_v10  ;;  %383 = vst [vmem:[#allocation4 + $0x19] sm:$0xff] %v4430_v11 }
  0x69   : > { %384 = vst [vmem:[#allocation4 + $0x21] sm:$0xff] %v4431_v12  ;;  %399 = vst [vmem:[#allocation4 + $0xd9] sm:$0xff] %v4462_v13  ;;  %4833 = vmatpush3.bf16.msra.mxu0 %v5335_v45 }
  0x6a   : > { %400 = vst [vmem:[#allocation4 + $0xe1] sm:$0xff] %v4463_v14  ;;  %385 = vst [vmem:[#allocation4 + $0x31] sm:$0xff] %v4434_v19  ;;  %5265 = vmatpush3.bf16.msra.mxu1 %v5335_v45  ;;  %4914 = vmatprep.subr.bf16.mxu0 %v5337_v51  ;;  %v5340_v14 = vld [vmem:[#allocation8 + $0x68] sm:$0xff]  }
  0x6b   : > { %386 = vst [vmem:[#allocation4 + $0x39] sm:$0xff] %v4435_v20  ;;  %401 = vst [vmem:[#allocation4 + $0xf1] sm:$0xff] %v4466_v21  ;;  %4866 = vmatprep.subr.bf16.mxu1 %v5336_v50 }
  0x6c   : > { %402 = vst [vmem:[#allocation4 + $0xf9] sm:$0xff] %v4467_v22  ;;  %387 = vst [vmem:[#allocation4 + $0x49] sm:$0xff] %v4438_v24  ;;  %v5342_v22 = vld [vmem:[#allocation8 + $0x60] sm:$0xff]  }
  0x6d   : > { %388 = vst [vmem:[#allocation4 + $0x51] sm:$0xff] %v4439_v25  ;;  %403 = vst [vmem:[#allocation4 + $0x109] sm:$0xff] %v4470_v26 }
  0x6e   : > { %404 = vst [vmem:[#allocation4 + $0x111] sm:$0xff] %v4471_v27  ;;  %v463_v29 = vld [vmem:[#allocation4 + $0xc0] sm:$0xff]  ;;  %389 = vst [vmem:[#allocation4 + $0x61] sm:$0xff] %v4442_v35  ;;  %v5344_v27 = vld [vmem:[#allocation8 + $0x58] sm:$0xff]  }
  0x6f   : > { %v464_v30 = vld [vmem:[#allocation4 + $0xc8] sm:$0xff]  ;;  %390 = vst [vmem:[#allocation4 + $0x69] sm:$0xff] %v4443_v36  ;;  %405 = vst [vmem:[#allocation4 + $0x121] sm:$0xff] %v4474_v37  ;;  %v449_v46 = vld [vmem:[#allocation4 + $0x18] sm:$0xff] }
  0x70   : > { %v5720_v31 = vpack.c.bf16 %v464_v30, %v463_v29  ;;  %406 = vst [vmem:[#allocation4 + $0x129] sm:$0xff] %v4475_v38  ;;  %v450_v47 = vld [vmem:[#allocation4 + $0x20] sm:$0xff]  ;;  %391 = vst [vmem:[#allocation4 + $0x79] sm:$0xff] %v4446_v41  ;;  %v465_v48 = vld [vmem:[#allocation4 + $0xd8] sm:$0xff] }
  0x71   : > { %392 = vst [vmem:[#allocation4 + $0x81] sm:$0xff] %v4447_v42  ;;  %407 = vst [vmem:[#allocation4 + $0x139] sm:$0xff] %v4478_v43  ;;  %v466_v49 = vld [vmem:[#allocation4 + $0xe0] sm:$0xff]  ;;  %v5727_v52 = vpack.c.bf16 %v450_v47, %v449_v46  ;;  %v451_v54 = vld [vmem:[#allocation4 + $0x30] sm:$0xff] }
  0x72   : > { %4850 = vmatprep.mubr.bf16.mxu1 %v5720_v31  ;;  %408 = vst [vmem:[#allocation4 + $0x141] sm:$0xff] %v4479_v44  ;;  %v5729_v53 = vpack.c.bf16 %v466_v49, %v465_v48  ;;  %v452_v63 = vld [vmem:[#allocation4 + $0x38] sm:$0xff]  ;;  %v467_v0 = vld [vmem:[#allocation4 + $0xf0] sm:$0xff]  ;;  %393 = vst [vmem:[#allocation4 + $0x91] sm:$0xff] %v4450_v57 }
  0x73   : > { %v468_v1 = vld [vmem:[#allocation4 + $0xf8] sm:$0xff]  ;;  %394 = vst [vmem:[#allocation4 + $0x99] sm:$0xff] %v4451_v58  ;;  %409 = vst [vmem:[#allocation4 + $0x151] sm:$0xff] %v4482_v59  ;;  %v5735_v8 = vpack.c.bf16 %v452_v63, %v451_v54  ;;  %v453_v10 = vld [vmem:[#allocation4 + $0x48] sm:$0xff]  ;;  %4835 = vmatmul.mubr.bf16.vlgmr.msra.gmra.mxu0 %v5727_v52 }
  0x74   : > { %410 = vst [vmem:[#allocation4 + $0x159] sm:$0xff] %v4483_v60  ;;  %395 = vst [vmem:[#allocation4 + $0xa9] sm:$0xff] %v4454_v2  ;;  %v5737_v9 = vpack.c.bf16 %v468_v1, %v467_v0  ;;  %v454_v11 = vld [vmem:[#allocation4 + $0x50] sm:$0xff]  ;;  %4851 = vmatmul.mubr.bf16.vlgmr.msra.gmra.mxu1 %v5729_v53  ;;  %v469_v12 = vld [vmem:[#allocation4 + $0x108] sm:$0xff]  ;;  %4915 = vmatpush3.bf16.msra.mxu0 %v5337_v51 }
  0x75   : > { %396 = vst [vmem:[#allocation4 + $0xb1] sm:$0xff] %v4455_v3  ;;  %411 = vst [vmem:[#allocation4 + $0x169] sm:$0xff] %v4486_v4  ;;  %4867 = vmatpush3.bf16.msra.mxu1 %v5336_v50  ;;  %v470_v13 = vld [vmem:[#allocation4 + $0x110] sm:$0xff]  ;;  %4916 = vmatprep.subr.bf16.mxu0 %v5339_v7  ;;  %v455_v16 = vld [vmem:[#allocation4 + $0x60] sm:$0xff]  ;;  %v5743_v17 = vpack.c.bf16 %v454_v11, %v453_v10 }
  0x76   : > { %412 = vst [vmem:[#allocation4 + $0x171] sm:$0xff] %v4487_v5  ;;  %4868 = vmatprep.subr.bf16.mxu1 %v5338_v6  ;;  %4838 = vmatprep.mubr.bf16.mxu0 %v5735_v8  ;;  %v5745_v18 = vpack.c.bf16 %v470_v13, %v469_v12  ;;  %v456_v19 = vld [vmem:[#allocation4 + $0x68] sm:$0xff]  ;;  %v471_v20 = vld [vmem:[#allocation4 + $0x120] sm:$0xff]  ;;  %v5348_v44 = vld [vmem:[#allocation8 + $0x48] sm:$0xff]  }
  0x77   : > { %4854 = vmatprep.mubr.bf16.mxu1 %v5737_v9  ;;  %v472_v21 = vld [vmem:[#allocation4 + $0x128] sm:$0xff]  ;;  %v5747_v24 = vpack.c.bf16 %v456_v19, %v455_v16  ;;  %v457_v26 = vld [vmem:[#allocation4 + $0x78] sm:$0xff]  ;;  %v5350_v57 = vld [vmem:[#allocation8 + $0x40] sm:$0xff]  }
  0x78   : > { %4917 = vmatpush3.bf16.msra.mxu0 %v5339_v7  ;;  %v5749_v25 = vpack.c.bf16 %v472_v21, %v471_v20  ;;  %v458_v28 = vld [vmem:[#allocation4 + $0x80] sm:$0xff]  ;;  %v473_v29 = vld [vmem:[#allocation4 + $0x138] sm:$0xff]  ;;  %v817_v50 = vld [vmem:[#allocation4 + $0x9] sm:$0xff] }
  0x79   : > { %4869 = vmatpush3.bf16.msra.mxu1 %v5338_v6  ;;  %4918 = vmatprep.subr.bf16.mxu0 %v5341_v15  ;;  %v474_v30 = vld [vmem:[#allocation4 + $0x140] sm:$0xff]  ;;  %v459_v33 = vld [vmem:[#allocation4 + $0x90] sm:$0xff]  ;;  %v5755_v36 = vpack.c.bf16 %v458_v28, %v457_v26  ;;  %v5349_v48 = vld [vmem:[#allocation8 + $0x88] sm:$0xff]  }
  0x7a   : > { %4870 = vmatprep.subr.bf16.mxu1 %v5340_v14  ;;  %v460_v34 = vld [vmem:[#allocation4 + $0x98] sm:$0xff]  ;;  %v475_v35 = vld [vmem:[#allocation4 + $0x150] sm:$0xff]  ;;  %v5757_v37 = vpack.c.bf16 %v474_v30, %v473_v29  ;;  %v816_v49 = vld [vmem:[#allocation4 + $0x1] sm:$0xff] }
  0x7b   : > { %4839 = vmatmul.mubr.bf16.gmra.mxu0 %v5743_v17  ;;  %v476_v38 = vld [vmem:[#allocation4 + $0x158] sm:$0xff]  ;;  %v5759_v41 = vpack.c.bf16 %v460_v34, %v459_v33  ;;  %v461_v43 = vld [vmem:[#allocation4 + $0xa8] sm:$0xff]  ;;  %v5351_v58 = vld [vmem:[#allocation8 + $0x80] sm:$0xff]   ;;  %v880_v59 = vpack.c.bf16 %v817_v50, %v816_v49 }
  0x7c   : > { %4855 = vmatmul.mubr.bf16.gmra.mxu1 %v5745_v18  ;;  %4919 = vmatpush3.bf16.msra.mxu0 %v5341_v15  ;;  %v5761_v42 = vpack.c.bf16 %v476_v38, %v475_v35  ;;  %v462_v45 = vld [vmem:[#allocation4 + $0xb0] sm:$0xff]  ;;  %v477_v46 = vld [vmem:[#allocation4 + $0x168] sm:$0xff]  ;;  %v1188_v61 = vld [vmem:[#allocation4 + $0x1a] sm:$0xff] }
  0x7d   : > { %4871 = vmatpush3.bf16.msra.mxu1 %v5340_v14  ;;  %4920 = vmatprep.subr.bf16.mxu0 %v5343_v23  ;;  %v478_v47 = vld [vmem:[#allocation4 + $0x170] sm:$0xff]  ;;  %v1186_v51 = vld [vmem:[#allocation4 + $0x2] sm:$0xff]  ;;  %v5767_v54 = vpack.c.bf16 %v462_v45, %v461_v43  ;;  %v1191_v2 = vld [vmem:[#allocation4 + $0x3a] sm:$0xff] }
  0x7e   : > { %4872 = vmatprep.subr.bf16.mxu1 %v5342_v22  ;;  %4842 = vmatprep.mubr.bf16.mxu0 %v5747_v24  ;;  %v5769_v55 = vpack.c.bf16 %v478_v47, %v477_v46  ;;  %v1250_v60 = vpack.c.bf16 %v1187_v56, %v1186_v51  ;;  %v1189_v62 = vld [vmem:[#allocation4 + $0x22] sm:$0xff]  ;;  %v1190_v1 = vld [vmem:[#allocation4 + $0x32] sm:$0xff]  ;;  %v1192_v11 = vld [vmem:[#allocation4 + $0x4a] sm:$0xff] }
  0x7f   : > { %4858 = vmatprep.mubr.bf16.mxu1 %v5749_v25  ;;  %v5353_v63 = vld [vmem:[#allocation8 + $0xf8] sm:$0xff]   ;;  %v5774_v3 = vld [vmem:[%s5703_s28] sm:$0xff]  ;;  %v5776_v4 = vpack.c.bf16 %v1189_v62, %v1188_v61  ;;  %v5779_v5 = vld [vmem:[%s5703_s28 + $0x8] sm:$0xff]  ;;  %v5781_v6 = vpack.c.bf16 %v1191_v2, %v1190_v1 }
  0x80   : > { %4921 = vmatpush3.bf16.msra.mxu0 %v5343_v23  ;;  %v5354_v0 = vld [vmem:[#allocation8 + $0x138] sm:$0xff]   ;;  %v5357_v7 = vld [vmem:[#allocation8 + $0xf0] sm:$0xff]   ;;  %v1193_v12 = vld [vmem:[#allocation4 + $0x52] sm:$0xff] }
  0x81   : > { %4873 = vmatpush3.bf16.msra.mxu1 %v5342_v22  ;;  %4922 = vmatprep.subr.bf16.mxu0 %v5345_v32  ;;  %v5358_v10 = vld [vmem:[#allocation8 + $0x130] sm:$0xff]   ;;  %v1195_v14 = vld [vmem:[#allocation4 + $0x6a] sm:$0xff]  ;;  %v5361_v15 = vld [vmem:[#allocation8 + $0xe8] sm:$0xff]   ;;  %v5790_v20 = vpack.c.bf16 %v1193_v12, %v1192_v11 }
  0x82   : > { %4874 = vmatprep.subr.bf16.mxu1 %v5344_v27  ;;  %v1194_v13 = vld [vmem:[#allocation4 + $0x62] sm:$0xff]  ;;  %v5362_v16 = vld [vmem:[#allocation8 + $0x128] sm:$0xff]   ;;  %v5365_v23 = vld [vmem:[#allocation8 + $0xe0] sm:$0xff]  }
  0x83   : > { %4843 = vmatmul.mubr.bf16.gmra.mxu0 %v5755_v36  ;;  %v5788_v19 = vld [vmem:[%s5703_s28 + $0x10] sm:$0xff]  ;;  %v5793_v21 = vld [vmem:[%s5703_s28 + $0x18] sm:$0xff]  ;;  %v5795_v22 = vpack.c.bf16 %v1195_v14, %v1194_v13  ;;  %v5366_v28 = vld [vmem:[#allocation8 + $0x120] sm:$0xff]  }
  0x84   : > { %4859 = vmatmul.mubr.bf16.gmra.mxu1 %v5757_v37  ;;  %4923 = vmatpush3.bf16.msra.mxu0 %v5345_v32  ;;  %v1196_v26 = vld [vmem:[#allocation4 + $0x7a] sm:$0xff]  ;;  %v1198_v29 = vld [vmem:[#allocation4 + $0x92] sm:$0xff]  ;;  %v5369_v32 = vld [vmem:[#allocation8 + $0xd8] sm:$0xff]  }
  0x85   : > { %4875 = vmatpush3.bf16.msra.mxu1 %v5344_v27  ;;  %4924 = vmatprep.subr.bf16.mxu0 %v5347_v40  ;;  %v1197_v27 = vld [vmem:[#allocation4 + $0x82] sm:$0xff]  ;;  %v1199_v30 = vld [vmem:[#allocation4 + $0x9a] sm:$0xff]  ;;  %v5802_v34 = vld [vmem:[%s5703_s28 + $0x20] sm:$0xff] }
  0x86   : > { %4876 = vmatprep.subr.bf16.mxu1 %v5346_v39  ;;  %4846 = vmatprep.mubr.bf16.mxu0 %v5759_v41  ;;  %v5370_v33 = vld [vmem:[#allocation8 + $0x118] sm:$0xff]   ;;  %v5804_v35 = vpack.c.bf16 %v1197_v27, %v1196_v26  ;;  %v5807_v38 = vld [vmem:[%s5703_s28 + $0x28] sm:$0xff]  ;;  %v5817_v51 = vld [vmem:[%s5703_s28 + $0x30] sm:$0xff] }
  0x87   : > { %4862 = vmatprep.mubr.bf16.mxu1 %v5761_v42  ;;  %v1200_v43 = vld [vmem:[#allocation4 + $0xaa] sm:$0xff]  ;;  %v1201_v45 = vld [vmem:[#allocation4 + $0xb2] sm:$0xff]  ;;  %v1202_v46 = vld [vmem:[#allocation4 + $0xc2] sm:$0xff] }
  0x88   : > { %4925 = vmatpush3.bf16.msra.mxu0 %v5347_v40  ;;  %v5373_v40 = vld [vmem:[#allocation8 + $0xd0] sm:$0xff]   ;;  %v1203_v47 = vld [vmem:[#allocation4 + $0xca] sm:$0xff]  ;;  %v5378_v49 = vld [vmem:[#allocation8 + $0x108] sm:$0xff]   ;;  %v5819_v56 = vpack.c.bf16 %v1201_v45, %v1200_v43 }
  0x89   : > { %4877 = vmatpush3.bf16.msra.mxu1 %v5346_v39  ;;  %4926 = vmatprep.subr.bf16.mxu0 %v5349_v48  ;;  %v5809_v39 = vpack.c.bf16 %v1199_v30, %v1198_v29  ;;  %v4586_v50 = vld [vmem:[%s5703_s28 + $0x78] sm:$0xff]   ;;  %v5381_v61 = vld [vmem:[#allocation8 + $0xc0] sm:$0xff]   ;;  %v1207_v2 = vld [vmem:[#allocation4 + $0xfa] sm:$0xff] }
  0x8a   : > { %4878 = vmatprep.subr.bf16.mxu1 %v5348_v44  ;;  %v5382_v62 = vld [vmem:[#allocation8 + $0x100] sm:$0xff]   ;;  %v5836_v13 = vld [vmem:[%s5703_s28 + $0x48] sm:$0xff]  ;;  %v5845_v27 = vld [vmem:[%s5703_s28 + $0x50] sm:$0xff] }
  0x8b   : > { %4847 = vmatmul.mubr.bf16.gmra.mxu0 %v5767_v54  ;;  %v1206_v1 = vld [vmem:[#allocation4 + $0xf2] sm:$0xff]  ;;  %v1211_v26 = vld [vmem:[#allocation4 + $0x12a] sm:$0xff]  ;;  %v1215_v43 = vld [vmem:[#allocation4 + $0x15a] sm:$0xff] }
  0x8c   : > { %4863 = vmatmul.mubr.bf16.gmra.mxu1 %v5769_v55  ;;  %4927 = vmatpush3.bf16.msra.mxu0 %v5349_v48  ;;  %v5377_v48 = vld [vmem:[#allocation8 + $0xc8] sm:$0xff]   ;;  %v5831_v11 = vld [vmem:[%s5703_s28 + $0x40] sm:$0xff]  ;;  %v5838_v14 = vpack.c.bf16 %v1207_v2, %v1206_v1  ;;  %v5850_v29 = vld [vmem:[%s5703_s28 + $0x58] sm:$0xff] }
  0x8d   : > { %4879 = vmatpush3.bf16.msra.mxu1 %v5348_v44  ;;  %4928 = vmatprep.subr.bf16.mxu0 %v5351_v58  ;;  %v5374_v44 = vld [vmem:[#allocation8 + $0x110] sm:$0xff]  }
  0x8e   : > { %4880 = vmatprep.subr.bf16.mxu1 %v5350_v57  ;;  %4882 = vmatprep.mubr.bf16.mxu1 %v880_v59  ;;  %v5822_v59 = vld [vmem:[%s5703_s28 + $0x38] sm:$0xff]  ;;  %v5402_v2 = vld [vmem:[#allocation8 + $0x1f0] sm:$0xff]  }
  0x8f   : > { %4930 = vmatprep.mubr.bf16.mxu0 %v1250_v60  ;;  %v5824_v60 = vpack.c.bf16 %v1203_v47, %v1202_v46  ;;  %v5864_v46 = vld [vmem:[%s5703_s28 + $0x68] sm:$0xff] }
  0x90   : > { %4929 = vmatpush3.bf16.msra.mxu0 %v5351_v58  ;;  %v4491_v58 = vunpack.c.h.bf16 %v4586_v50 }
  0x91   : > { %4881 = vmatpush3.bf16.msra.mxu1 %v5350_v57  ;;  %5010 = vmatprep.subr.bf16.mxu0 %v5354_v0  ;;  %v4490_v57 = vunpack.c.l.bf16 %v4586_v50  ;;  %v5873_v50 = vld [vmem:[%s5703_s28 + $0x70] sm:$0xff] }
  0x92   : > { %4962 = vmatprep.subr.bf16.mxu1 %v5353_v63  ;;  %414 = vst [vmem:[#allocation4 + $0x189] sm:$0xff] %v4491_v58  ;;  %v5385_v58 = vld [vmem:[#allocation8 + $0x170] sm:$0xff]  }
  0x93   : > { %4931 = vmatmul.mubr.bf16.vlgmr.msra.gmra.mxu0 %v5776_v4  ;;  %413 = vst [vmem:[#allocation4 + $0x181] sm:$0xff] %v4490_v57 }
  0x94   : > { %4883 = vmatmul.mubr.bf16.vlgmr.msra.gmra.mxu1 %v5774_v3  ;;  %5011 = vmatpush3.bf16.msra.mxu0 %v5354_v0  ;;  %v1205_v0 = vld [vmem:[#allocation4 + $0xe2] sm:$0xff] }
  0x95   : > { %4963 = vmatpush3.bf16.msra.mxu1 %v5353_v63  ;;  %4886 = vmatprep.mubr.bf16.mxu1 %v5779_v5  ;;  %v1204_v63 = vld [vmem:[#allocation4 + $0xda] sm:$0xff] }
  0x96   : > { %4934 = vmatprep.mubr.bf16.mxu0 %v5781_v6  ;;  %4964 = vmatprep.subr.bf16.mxu1 %v5357_v7  ;;  %v5833_v12 = vpack.c.bf16 %v1205_v0, %v1204_v63  ;;  %v5388_v63 = vld [vmem:[#allocation8 + $0x1a8] sm:$0xff]  }
  0x97   : > { %5012 = vmatprep.subr.bf16.mxu0 %v5358_v10 }
  0x98   : > { %5013 = vmatpush3.bf16.msra.mxu0 %v5358_v10  ;;  %v5384_v10 = vld [vmem:[#allocation8 + $0x1b8] sm:$0xff]  }
  0x99   : > { %4965 = vmatpush3.bf16.msra.mxu1 %v5357_v7  ;;  %5014 = vmatprep.subr.bf16.mxu0 %v5362_v16  ;;  %v5383_v7 = vld [vmem:[#allocation8 + $0x178] sm:$0xff]  }
  0x9a   : > { %4966 = vmatprep.subr.bf16.mxu1 %v5361_v15 }
  0x9b   : > { %4935 = vmatmul.mubr.bf16.gmra.mxu0 %v5790_v20 }
  0x9c   : > { %4887 = vmatmul.mubr.bf16.gmra.mxu1 %v5788_v19  ;;  %4938 = vmatprep.mubr.bf16.mxu0 %v5795_v22 }
  0x9d   : > { %4890 = vmatprep.mubr.bf16.mxu1 %v5793_v21  ;;  %4967 = vmatpush3.bf16.msra.mxu1 %v5361_v15  ;;  %v1208_v15 = vld [vmem:[#allocation4 + $0x10a] sm:$0xff] }
  0x9e   : > { %5015 = vmatpush3.bf16.msra.mxu0 %v5362_v16  ;;  %4968 = vmatprep.subr.bf16.mxu1 %v5365_v23  ;;  %v1209_v16 = vld [vmem:[#allocation4 + $0x112] sm:$0xff] }
  0x9f   : > { %5016 = vmatprep.subr.bf16.mxu0 %v5366_v28 }
  0xa1   : > { %4969 = vmatpush3.bf16.msra.mxu1 %v5365_v23  ;;  %v1210_v23 = vld [vmem:[#allocation4 + $0x122] sm:$0xff] }
  0xa2   : > { %5017 = vmatpush3.bf16.msra.mxu0 %v5366_v28  ;;  %4970 = vmatprep.subr.bf16.mxu1 %v5369_v32  ;;  %v5847_v28 = vpack.c.bf16 %v1209_v16, %v1208_v15  ;;  %v5852_v30 = vpack.c.bf16 %v1211_v26, %v1210_v23  ;;  %v5404_v15 = vld [vmem:[#allocation8 + $0x1e8] sm:$0xff]  }
  0xa3   : > { %5018 = vmatprep.subr.bf16.mxu0 %v5370_v33  ;;  %4939 = vmatmul.mubr.bf16.gmra.mxu0 %v5804_v35  ;;  %v5405_v16 = vld [vmem:[#allocation8 + $0x228] sm:$0xff]  }
  0xa4   : > { %4891 = vmatmul.mubr.bf16.gmra.mxu1 %v5802_v34  ;;  %4942 = vmatprep.mubr.bf16.mxu0 %v5809_v39 }
  0xa5   : > { %4894 = vmatprep.mubr.bf16.mxu1 %v5807_v38  ;;  %4971 = vmatpush3.bf16.msra.mxu1 %v5369_v32  ;;  %v1212_v32 = vld [vmem:[#allocation4 + $0x13a] sm:$0xff] }
  0xa6   : > { %5019 = vmatpush3.bf16.msra.mxu0 %v5370_v33  ;;  %4972 = vmatprep.subr.bf16.mxu1 %v5373_v40  ;;  %v1213_v33 = vld [vmem:[#allocation4 + $0x142] sm:$0xff] }
  0xa7   : > { %5020 = vmatprep.subr.bf16.mxu0 %v5374_v44  ;;  %v5861_v45 = vpack.c.bf16 %v1213_v33, %v1212_v32  ;;  %v2679_v32 = vld [vmem:[#allocation4 + $0xc0] sm:$0xff]  ;;  %v2680_v33 = vld [vmem:[#allocation4 + $0xc8] sm:$0xff] }
  0xa9   : > { %4973 = vmatpush3.bf16.msra.mxu1 %v5373_v40  ;;  %v1214_v40 = vld [vmem:[#allocation4 + $0x152] sm:$0xff] }
  0xaa   : > { %5021 = vmatpush3.bf16.msra.mxu0 %v5374_v44  ;;  %4974 = vmatprep.subr.bf16.mxu1 %v5377_v48  ;;  %v5859_v44 = vld [vmem:[%s5703_s28 + $0x60] sm:$0xff]  ;;  %v5866_v47 = vpack.c.bf16 %v1215_v43, %v1214_v40  ;;  %v5408_v40 = vld [vmem:[#allocation8 + $0x1d8] sm:$0xff]  }
  0xab   : > { %5022 = vmatprep.subr.bf16.mxu0 %v5378_v49  ;;  %4943 = vmatmul.mubr.bf16.gmra.mxu0 %v5819_v56  ;;  %v5409_v43 = vld [vmem:[#allocation8 + $0x218] sm:$0xff]  }
  0xac   : > { %4895 = vmatmul.mubr.bf16.gmra.mxu1 %v5817_v51  ;;  %4946 = vmatprep.mubr.bf16.mxu0 %v5824_v60 }
  0xad   : > { %4898 = vmatprep.mubr.bf16.mxu1 %v5822_v59  ;;  %4975 = vmatpush3.bf16.msra.mxu1 %v5377_v48  ;;  %v1216_v48 = vld [vmem:[#allocation4 + $0x16a] sm:$0xff] }
  0xae   : > { %5023 = vmatpush3.bf16.msra.mxu0 %v5378_v49  ;;  %4976 = vmatprep.subr.bf16.mxu1 %v5381_v61  ;;  %v1217_v49 = vld [vmem:[#allocation4 + $0x172] sm:$0xff] }
  0xaf   : > { %5024 = vmatprep.subr.bf16.mxu0 %v5382_v62  ;;  %v5875_v57 = vpack.c.bf16 %v1217_v49, %v1216_v48  ;;  %v5411_v48 = vld [vmem:[#allocation8 + $0x210] sm:$0xff]  }
  0xb0   : > { %v2682_v49 = vld [vmem:[#allocation4 + $0xe0] sm:$0xff] }
  0xb1   : > { %4977 = vmatpush3.bf16.msra.mxu1 %v5381_v61  ;;  %v5386_v61 = vld [vmem:[#allocation8 + $0x1b0] sm:$0xff]  }
  0xb2   : > { %5025 = vmatpush3.bf16.msra.mxu0 %v5382_v62  ;;  %5058 = vmatprep.subr.bf16.mxu1 %v5383_v7  ;;  %v5387_v62 = vld [vmem:[#allocation8 + $0x168] sm:$0xff]  }
  0xb3   : > { %5106 = vmatprep.subr.bf16.mxu0 %v5384_v10  ;;  %4947 = vmatmul.mubr.bf16.gmra.mxu0 %v5833_v12 }
  0xb4   : > { %4899 = vmatmul.mubr.bf16.gmra.mxu1 %v5831_v11  ;;  %4950 = vmatprep.mubr.bf16.mxu0 %v5838_v14 }
  0xb5   : > { %4902 = vmatprep.mubr.bf16.mxu1 %v5836_v13 }
  0xbb   : > { %4951 = vmatmul.mubr.bf16.gmra.mxu0 %v5847_v28 }
  0xbc   : > { %4903 = vmatmul.mubr.bf16.gmra.mxu1 %v5845_v27  ;;  %4954 = vmatprep.mubr.bf16.mxu0 %v5852_v30 }
  0xbd   : > { %4906 = vmatprep.mubr.bf16.mxu1 %v5850_v29 }
  0xc3   : > { %4955 = vmatmul.mubr.bf16.gmra.mxu0 %v5861_v45 }
  0xc4   : > { %4907 = vmatmul.mubr.bf16.gmra.mxu1 %v5859_v44  ;;  %4958 = vmatprep.mubr.bf16.mxu0 %v5866_v47 }
  0xc5   : > { %4910 = vmatprep.mubr.bf16.mxu1 %v5864_v46 }
  0xcb   : > { %4959 = vmatmul.mubr.bf16.gmra.mxu0 %v5875_v57 }
  0xcc   : > { %4911 = vmatmul.mubr.bf16.gmra.mxu1 %v5873_v50  ;;  %5026 = vmatprep.mubr.bf16.mxu0 %v5774_v3  ;;  %v5390_v3 = vld [vmem:[#allocation8 + $0x1a0] sm:$0xff]  }
  0xcd   : > { %4978 = vmatprep.mubr.bf16.mxu1 %v5727_v52  ;;  %v5389_v52 = vld [vmem:[#allocation8 + $0x160] sm:$0xff]  }
  0xd3   : > { %5027 = vmatmul.mubr.bf16.vlgmr.msra.gmra.mxu0 %v5779_v5  ;;  %v5393_v5 = vld [vmem:[#allocation8 + $0x150] sm:$0xff]  }
  0xd4   : > { %4979 = vmatmul.mubr.bf16.vlgmr.msra.gmra.mxu1 %v5735_v8  ;;  %5107 = vmatpush3.bf16.msra.mxu0 %v5384_v10  ;;  %v5391_v8 = vld [vmem:[#allocation8 + $0x158] sm:$0xff]   ;;  %v2673_v10 = vld [vmem:[#allocation4 + $0x78] sm:$0xff] }
  0xd5   : > { %5059 = vmatpush3.bf16.msra.mxu1 %v5383_v7  ;;  %4982 = vmatprep.mubr.bf16.mxu1 %v5743_v17  ;;  %v5392_v17 = vld [vmem:[#allocation8 + $0x198] sm:$0xff]   ;;  %v5403_v7 = vld [vmem:[#allocation8 + $0x230] sm:$0xff]  }
  0xd6   : > { %5030 = vmatprep.mubr.bf16.mxu0 %v5788_v19  ;;  %5060 = vmatprep.subr.bf16.mxu1 %v5385_v58  ;;  %v5394_v19 = vld [vmem:[#allocation8 + $0x190] sm:$0xff]  }
  0xd7   : > { %5108 = vmatprep.subr.bf16.mxu0 %v5386_v61 }
  0xd8   : > { %5109 = vmatpush3.bf16.msra.mxu0 %v5386_v61  ;;  %v5412_v61 = vld [vmem:[#allocation8 + $0x1c8] sm:$0xff]  }
  0xd9   : > { %5061 = vmatpush3.bf16.msra.mxu1 %v5385_v58  ;;  %5110 = vmatprep.subr.bf16.mxu0 %v5388_v63  ;;  %v2684_v58 = vld [vmem:[#allocation4 + $0xf8] sm:$0xff] }
  0xda   : > { %5062 = vmatprep.subr.bf16.mxu1 %v5387_v62 }
  0xdb   : > { %5031 = vmatmul.mubr.bf16.gmra.mxu0 %v5793_v21  ;;  %v5398_v21 = vld [vmem:[#allocation8 + $0x140] sm:$0xff]  }
  0xdc   : > { %4983 = vmatmul.mubr.bf16.gmra.mxu1 %v5747_v24  ;;  %5034 = vmatprep.mubr.bf16.mxu0 %v5802_v34  ;;  %v5395_v24 = vld [vmem:[#allocation8 + $0x148] sm:$0xff]   ;;  %v5399_v34 = vld [vmem:[#allocation8 + $0x180] sm:$0xff]  }
  0xdd   : > { %4986 = vmatprep.mubr.bf16.mxu1 %v5755_v36  ;;  %5063 = vmatpush3.bf16.msra.mxu1 %v5387_v62  ;;  %v5396_v36 = vld [vmem:[#allocation8 + $0x188] sm:$0xff]  }
  0xde   : > { %5111 = vmatpush3.bf16.msra.mxu0 %v5388_v63  ;;  %5064 = vmatprep.subr.bf16.mxu1 %v5389_v52  ;;  %v5413_v62 = vld [vmem:[#allocation8 + $0x208] sm:$0xff]  }
  0xdf   : > { %5112 = vmatprep.subr.bf16.mxu0 %v5390_v3 }
  0xe1   : > { %5065 = vmatpush3.bf16.msra.mxu1 %v5389_v52 }
  0xe2   : > { %5113 = vmatpush3.bf16.msra.mxu0 %v5390_v3  ;;  %5066 = vmatprep.subr.bf16.mxu1 %v5391_v8  ;;  %v5415_v3 = vld [vmem:[#allocation8 + $0x200] sm:$0xff]  }
  0xe3   : > { %5114 = vmatprep.subr.bf16.mxu0 %v5392_v17  ;;  %5035 = vmatmul.mubr.bf16.gmra.mxu0 %v5807_v38 }
  0xe4   : > { %4987 = vmatmul.mubr.bf16.gmra.mxu1 %v5759_v41  ;;  %5038 = vmatprep.mubr.bf16.mxu0 %v5817_v51  ;;  %v5400_v41 = vld [vmem:[#allocation8 + $0x1f8] sm:$0xff]  }
  0xe5   : > { %4990 = vmatprep.mubr.bf16.mxu1 %v5767_v54  ;;  %5067 = vmatpush3.bf16.msra.mxu1 %v5391_v8  ;;  %v5401_v54 = vld [vmem:[#allocation8 + $0x238] sm:$0xff]   ;;  %v2686_v8 = vld [vmem:[#allocation4 + $0x110] sm:$0xff] }
  0xe6   : > { %5115 = vmatpush3.bf16.msra.mxu0 %v5392_v17  ;;  %5068 = vmatprep.subr.bf16.mxu1 %v5393_v5  ;;  %v2687_v17 = vld [vmem:[#allocation4 + $0x120] sm:$0xff] }
  0xe7   : > { %5116 = vmatprep.subr.bf16.mxu0 %v5394_v19 }
  0xe9   : > { %5069 = vmatpush3.bf16.msra.mxu1 %v5393_v5  ;;  %v2688_v5 = vld [vmem:[#allocation4 + $0x128] sm:$0xff] }
  0xea   : > { %5117 = vmatpush3.bf16.msra.mxu0 %v5394_v19  ;;  %5070 = vmatprep.subr.bf16.mxu1 %v5395_v24 }
  0xeb   : > { %5118 = vmatprep.subr.bf16.mxu0 %v5396_v36  ;;  %5039 = vmatmul.mubr.bf16.gmra.mxu0 %v5822_v59  ;;  %v2672_v59 = vld [vmem:[#allocation4 + $0x68] sm:$0xff] }
  0xec   : > { %4991 = vmatmul.mubr.bf16.gmra.mxu1 %v5720_v31  ;;  %5042 = vmatprep.mubr.bf16.mxu0 %v5831_v11  ;;  %v1586_v31 = vld [vmem:[#allocation4 + $0x180] sm:$0xff] }
  0xed   : > { %4994 = vmatprep.mubr.bf16.mxu1 %v5729_v53  ;;  %5071 = vmatpush3.bf16.msra.mxu1 %v5395_v24  ;;  %v1587_v53 = vld [vmem:[#allocation4 + $0x188] sm:$0xff]  ;;  %v2674_v11 = vld [vmem:[#allocation4 + $0x80] sm:$0xff]  ;;  %v2741_v24 = vpack.c.bf16 %v2688_v5, %v2687_v17 }
  0xee   : > { %5119 = vmatpush3.bf16.msra.mxu0 %v5396_v36  ;;  %5072 = vmatprep.subr.bf16.mxu1 %v5398_v21  ;;  %v5909_v38 = vpack.c.bf16 %v1587_v53, %v1586_v31  ;;  %v2734_v23 = vpack.c.bf16 %v2674_v11, %v2673_v10  ;;  %v2692_v31 = vld [vmem:[#allocation4 + $0x158] sm:$0xff] }
  0xef   : > { %5120 = vmatprep.subr.bf16.mxu0 %v5399_v34 }
  0xf1   : > { %5073 = vmatpush3.bf16.msra.mxu1 %v5398_v21 }
  0xf2   : > { %5121 = vmatpush3.bf16.msra.mxu0 %v5399_v34  ;;  %5154 = vmatprep.subr.bf16.mxu1 %v5400_v41 }
  0xf3   : > { %5202 = vmatprep.subr.bf16.mxu0 %v5401_v54  ;;  %5043 = vmatmul.mubr.bf16.gmra.mxu0 %v5836_v13  ;;  %v2675_v13 = vld [vmem:[#allocation4 + $0x90] sm:$0xff] }
  0xf4   : > { %4995 = vmatmul.mubr.bf16.gmra.mxu1 %v5737_v9  ;;  %5046 = vmatprep.mubr.bf16.mxu0 %v5845_v27  ;;  %v2667_v9 = vld [vmem:[#allocation4 + $0x30] sm:$0xff] }
  0xf5   : > { %4998 = vmatprep.mubr.bf16.mxu1 %v5745_v18  ;;  %v2668_v18 = vld [vmem:[#allocation4 + $0x38] sm:$0xff]  ;;  %v5407_v27 = vld [vmem:[#allocation8 + $0x220] sm:$0xff]  }
  0xf6   : > { %v2731_v51 = vpack.c.bf16 %v2668_v18, %v2667_v9 }
  0xfb   : > { %5047 = vmatmul.mubr.bf16.gmra.mxu0 %v5850_v29  ;;  %v2678_v29 = vld [vmem:[#allocation4 + $0xb0] sm:$0xff] }
  0xfc   : > { %4999 = vmatmul.mubr.bf16.gmra.mxu1 %v5749_v25  ;;  %5050 = vmatprep.mubr.bf16.mxu0 %v5859_v44  ;;  %v5912_v25 = vld [vmem:[%s5703_s28 + $0x78] sm:$0xff] }
  0xfd   : > { %5002 = vmatprep.mubr.bf16.mxu1 %v5757_v37  ;;  %v2669_v37 = vld [vmem:[#allocation4 + $0x48] sm:$0xff] }
 0x103   : > { %5051 = vmatmul.mubr.bf16.gmra.mxu0 %v5864_v46  ;;  %v2737_v46 = vpack.c.bf16 %v2680_v33, %v2679_v32  ;;  %v5416_v33 = vld [vmem:[#allocation4] sm:$0xff] }
 0x104   : > { %5003 = vmatmul.mubr.bf16.gmra.mxu1 %v5761_v42  ;;  %5054 = vmatprep.mubr.bf16.mxu0 %v5873_v50  ;;  %v2670_v42 = vld [vmem:[#allocation4 + $0x50] sm:$0xff] }
 0x105   : > { %5006 = vmatprep.mubr.bf16.mxu1 %v5769_v55  ;;  %v2671_v55 = vld [vmem:[#allocation4 + $0x60] sm:$0xff]  ;;  %v2732_v0 = vpack.c.bf16 %v2670_v42, %v2669_v37  ;;  %v2683_v50 = vld [vmem:[#allocation4 + $0xf0] sm:$0xff] }
 0x106   : > { %v2733_v1 = vpack.c.bf16 %v2672_v59, %v2671_v55  ;;  %v2739_v52 = vpack.c.bf16 %v2684_v58, %v2683_v50  ;;  %v2693_v55 = vld [vmem:[#allocation4 + $0x168] sm:$0xff]  ;;  %v2694_v59 = vld [vmem:[#allocation4 + $0x170] sm:$0xff] }
 0x107   : > { %v2744_v10 = vpack.c.bf16 %v2694_v59, %v2693_v55  ;;  %v3410_v50 = vld [vmem:[#allocation4 + $0x52] sm:$0xff]  ;;  %v3041_v58 = vld [vmem:[#allocation4 + $0x61] sm:$0xff] }
 0x108   : > { %v3413_v55 = vld [vmem:[#allocation4 + $0x7a] sm:$0xff]  ;;  %v3414_v59 = vld [vmem:[#allocation4 + $0x82] sm:$0xff] }
 0x10b   : > { %5055 = vmatmul.mubr.bf16.gmra.mxu0 %v5912_v25 }
 0x10c   : > { %5007 = vmatmul.mubr.bf16.gmra.mxu1 %v5909_v38  ;;  %5122 = vmatprep.mubr.bf16.mxu0 %v2731_v51 }
 0x10d   : > { %5074 = vmatprep.mubr.bf16.mxu1 %v5776_v4  ;;  %v2676_v4 = vld [vmem:[#allocation4 + $0x98] sm:$0xff] }
 0x10e   : > { %v2735_v26 = vpack.c.bf16 %v2676_v4, %v2675_v13 }
 0x113   : > { %5123 = vmatmul.mubr.bf16.vlgmr.msra.gmra.mxu0 %v2732_v0 }
 0x114   : > { %5075 = vmatmul.mubr.bf16.vlgmr.msra.gmra.mxu1 %v5781_v6  ;;  %5203 = vmatpush3.bf16.msra.mxu0 %v5401_v54  ;;  %v5406_v6 = vld [vmem:[#allocation8 + $0x1e0] sm:$0xff]  }
 0x115   : > { %5155 = vmatpush3.bf16.msra.mxu1 %v5400_v41  ;;  %5078 = vmatprep.mubr.bf16.mxu1 %v5790_v20  ;;  %v2677_v20 = vld [vmem:[#allocation4 + $0xa8] sm:$0xff]  ;;  %v2691_v54 = vld [vmem:[#allocation4 + $0x150] sm:$0xff] }
 0x116   : > { %5126 = vmatprep.mubr.bf16.mxu0 %v2733_v1  ;;  %5156 = vmatprep.subr.bf16.mxu1 %v5402_v2  ;;  %v2736_v44 = vpack.c.bf16 %v2678_v29, %v2677_v20  ;;  %v2743_v51 = vpack.c.bf16 %v2692_v31, %v2691_v54  ;;  %v3408_v20 = vld [vmem:[#allocation4 + $0x3a] sm:$0xff] }
 0x117   : > { %5204 = vmatprep.subr.bf16.mxu0 %v5403_v7  ;;  %v3043_v31 = vld [vmem:[#allocation4 + $0x79] sm:$0xff] }
 0x118   : > { %5205 = vmatpush3.bf16.msra.mxu0 %v5403_v7 }
 0x119   : > { %5157 = vmatpush3.bf16.msra.mxu1 %v5402_v2  ;;  %5206 = vmatprep.subr.bf16.mxu0 %v5405_v16 }
 0x11a   : > { %5158 = vmatprep.subr.bf16.mxu1 %v5404_v15 }
 0x11b   : > { %5127 = vmatmul.mubr.bf16.gmra.mxu0 %v2734_v23 }
 0x11c   : > { %5079 = vmatmul.mubr.bf16.gmra.mxu1 %v5795_v22  ;;  %5130 = vmatprep.mubr.bf16.mxu0 %v2735_v26  ;;  %v5410_v22 = vld [vmem:[#allocation8 + $0x1d0] sm:$0xff]  }
 0x11d   : > { %5082 = vmatprep.mubr.bf16.mxu1 %v5804_v35  ;;  %5159 = vmatpush3.bf16.msra.mxu1 %v5404_v15  ;;  %v2681_v35 = vld [vmem:[#allocation4 + $0xd8] sm:$0xff]  ;;  %v2327_v15 = vld [vmem:[#allocation4 + $0x18a] sm:$0xff] }
 0x11e   : > { %5207 = vmatpush3.bf16.msra.mxu0 %v5405_v16  ;;  %5160 = vmatprep.subr.bf16.mxu1 %v5406_v6  ;;  %v2738_v63 = vpack.c.bf16 %v2682_v49, %v2681_v35  ;;  %v3037_v16 = vld [vmem:[#allocation4 + $0x31] sm:$0xff] }
 0x11f   : > { %5208 = vmatprep.subr.bf16.mxu0 %v5407_v27  ;;  %v3040_v35 = vld [vmem:[#allocation4 + $0x51] sm:$0xff] }
 0x120   : > { %v3409_v49 = vld [vmem:[#allocation4 + $0x4a] sm:$0xff] }
 0x121   : > { %5161 = vmatpush3.bf16.msra.mxu1 %v5406_v6  ;;  %v3038_v6 = vld [vmem:[#allocation4 + $0x39] sm:$0xff]  ;;  %v3472_v17 = vpack.c.bf16 %v3410_v50, %v3409_v49 }
 0x122   : > { %5209 = vmatpush3.bf16.msra.mxu0 %v5407_v27  ;;  %5162 = vmatprep.subr.bf16.mxu1 %v5408_v40  ;;  %v3407_v27 = vld [vmem:[#allocation4 + $0x32] sm:$0xff] }
 0x123   : > { %5210 = vmatprep.subr.bf16.mxu0 %v5409_v43  ;;  %5131 = vmatmul.mubr.bf16.gmra.mxu0 %v2736_v44 }
 0x124   : > { %5083 = vmatmul.mubr.bf16.gmra.mxu1 %v5809_v39  ;;  %5134 = vmatprep.mubr.bf16.mxu0 %v2737_v46  ;;  %v5414_v39 = vld [vmem:[#allocation8 + $0x1c0] sm:$0xff]  }
 0x125   : > { %5086 = vmatprep.mubr.bf16.mxu1 %v5819_v56  ;;  %5163 = vmatpush3.bf16.msra.mxu1 %v5408_v40  ;;  %v2685_v56 = vld [vmem:[#allocation4 + $0x108] sm:$0xff]  ;;  %v3101_v40 = vpack.c.bf16 %v3038_v6, %v3037_v16  ;;  %v3046_v16 = vld [vmem:[#allocation4 + $0x99] sm:$0xff] }
 0x126   : > { %5211 = vmatpush3.bf16.msra.mxu0 %v5409_v43  ;;  %5164 = vmatprep.subr.bf16.mxu1 %v5410_v22  ;;  %v2740_v19 = vpack.c.bf16 %v2686_v8, %v2685_v56  ;;  %v3415_v6 = vld [vmem:[#allocation4 + $0x92] sm:$0xff] }
 0x127   : > { %5212 = vmatprep.subr.bf16.mxu0 %v5411_v48 }
 0x129   : > { %5165 = vmatpush3.bf16.msra.mxu1 %v5410_v22 }
 0x12a   : > { %5213 = vmatpush3.bf16.msra.mxu0 %v5411_v48  ;;  %5166 = vmatprep.subr.bf16.mxu1 %v5412_v61  ;;  %v3039_v48 = vld [vmem:[#allocation4 + $0x49] sm:$0xff] }
 0x12b   : > { %5214 = vmatprep.subr.bf16.mxu0 %v5413_v62  ;;  %5135 = vmatmul.mubr.bf16.gmra.mxu0 %v2738_v63  ;;  %v3042_v63 = vld [vmem:[#allocation4 + $0x69] sm:$0xff]  ;;  %v3102_v8 = vpack.c.bf16 %v3040_v35, %v3039_v48  ;;  %v3474_v48 = vpack.c.bf16 %v3414_v59, %v3413_v55 }
 0x12c   : > { %5087 = vmatmul.mubr.bf16.gmra.mxu1 %v5824_v60  ;;  %5138 = vmatprep.mubr.bf16.mxu0 %v2739_v52  ;;  %v2689_v60 = vld [vmem:[#allocation4 + $0x138] sm:$0xff]  ;;  %v3411_v52 = vld [vmem:[#allocation4 + $0x62] sm:$0xff]  ;;  %v3103_v5 = vpack.c.bf16 %v3042_v63, %v3041_v58 }
 0x12d   : > { %5090 = vmatprep.mubr.bf16.mxu1 %v5833_v12  ;;  %5167 = vmatpush3.bf16.msra.mxu1 %v5412_v61  ;;  %v2690_v12 = vld [vmem:[#allocation4 + $0x140] sm:$0xff]  ;;  %v3050_v55 = vld [vmem:[#allocation4 + $0xc9] sm:$0xff] }
 0x12e   : > { %5215 = vmatpush3.bf16.msra.mxu0 %v5413_v62  ;;  %5168 = vmatprep.subr.bf16.mxu1 %v5414_v39  ;;  %v2742_v18 = vpack.c.bf16 %v2690_v12, %v2689_v60  ;;  %v3419_v59 = vld [vmem:[#allocation4 + $0xc2] sm:$0xff] }
 0x12f   : > { %5216 = vmatprep.subr.bf16.mxu0 %v5415_v3 }
 0x131   : > { %5169 = vmatpush3.bf16.msra.mxu1 %v5414_v39  ;;  %v3412_v39 = vld [vmem:[#allocation4 + $0x6a] sm:$0xff] }
 0x132   : > { %5217 = vmatpush3.bf16.msra.mxu0 %v5415_v3 }
 0x133   : > { %v5925_v36 = vpop.f32.mrf.mxu0  ;;  %5139 = vmatmul.mubr.bf16.gmra.mxu0 %v2740_v19  ;;  %v3473_v19 = vpack.c.bf16 %v3412_v39, %v3411_v52 }
 0x134   : > { %v5927_v21 = vpop.f32.mrf.mxu1  ;;  %5091 = vmatmul.mubr.bf16.gmra.mxu1 %v5838_v14  ;;  %5142 = vmatprep.mubr.bf16.mxu0 %v2741_v24 }
 0x135   : > { %5094 = vmatprep.mubr.bf16.mxu1 %v5847_v28  ;;  %v5931_v34 = vpop.f32.mrf.mxu0 }
 0x136   : > { %v5933_v41 = vpop.f32.mrf.mxu1 }
 0x137   : > { %v5935_v53 = vpop.f32.mrf.mxu0 }
 0x138   : > { %v5937_v9 = vpop.f32.mrf.mxu1 }
 0x139   : > { %v5939_v37 = vpop.f32.mrf.mxu0 }
 0x13a   : > { %v5941_v14 = vpop.f32.mrf.mxu1 }
 0x13b   : > { %v5943_v28 = vpop.f32.mrf.mxu0  ;;  %5143 = vmatmul.mubr.bf16.gmra.mxu0 %v2742_v18  ;;  %v3044_v18 = vld [vmem:[#allocation4 + $0x81] sm:$0xff] }
 0x13c   : > { %v5945_v42 = vpop.f32.mrf.mxu1  ;;  %5095 = vmatmul.mubr.bf16.gmra.mxu1 %v5852_v30  ;;  %5146 = vmatprep.mubr.bf16.mxu0 %v2743_v51 }
 0x13d   : > { %5098 = vmatprep.mubr.bf16.mxu1 %v5861_v45  ;;  %v5949_v0 = vpop.f32.mrf.mxu0  ;;  %v2326_v45 = vld [vmem:[#allocation4 + $0x182] sm:$0xff] }
 0x13e   : > { %v5951_v1 = vpop.f32.mrf.mxu1 }
 0x13f   : > { %v5953_v2 = vpop.f32.mrf.mxu0 }
 0x140   : > { %v5955_v7 = vpop.f32.mrf.mxu1 }
 0x141   : > { %v5957_v11 = vpop.f32.mrf.mxu0 }
 0x142   : > { %v5959_v13 = vpop.f32.mrf.mxu1 }
 0x143   : > { %v5961_v30 = vpop.f32.mrf.mxu0  ;;  %5147 = vmatmul.mubr.bf16.gmra.mxu0 %v2744_v10  ;;  %v3045_v10 = vld [vmem:[#allocation4 + $0x91] sm:$0xff] }
 0x144   : > { %v5963_v4 = vpop.f32.mrf.mxu1  ;;  %5099 = vmatmul.mubr.bf16.gmra.mxu1 %v5866_v47  ;;  %5150 = vmatprep.mubr.bf16.mxu0 %v5909_v38  ;;  %v5976_v47 = vpack.c.bf16 %v2327_v15, %v2326_v45  ;;  %v3471_v38 = vpack.c.bf16 %v3408_v20, %v3407_v27  ;;  %v3416_v27 = vld [vmem:[#allocation4 + $0x9a] sm:$0xff]  ;;  %v3105_v49 = vpack.c.bf16 %v3046_v16, %v3045_v10 }
 0x145   : > { %5102 = vmatprep.mubr.bf16.mxu1 %v5875_v57  ;;  %v5968_v23 = vpop.f32.mrf.mxu0  ;;  %v2746_v57 = vpack.c.bf16 %v5416_v33, %v5416_v33  ;;  %v3475_v50 = vpack.c.bf16 %v3416_v27, %v3415_v6 }
 0x146   : > { %v5970_v26 = vpop.f32.mrf.mxu1 }
 0x147   : > { %v5972_v29 = vpop.f32.mrf.mxu0 }
 0x148   : > { %v5974_v32 = vpop.f32.mrf.mxu1 }
 0x149   : > { %v5978_v43 = vpop.f32.mrf.mxu0 }
 0x14a   : > { %v5980_v44 = vpop.f32.mrf.mxu1 }
 0x14b   : > { %v5982_v46 = vpop.f32.mrf.mxu0  ;;  %5151 = vmatmul.mubr.bf16.gmra.mxu0 %v2746_v57 }
 0x14c   : > { %v5984_v22 = vpop.f32.mrf.mxu1  ;;  %5103 = vmatmul.mubr.bf16.gmra.mxu1 %v5976_v47  ;;  %5218 = vmatprep.mubr.bf16.mxu0 %v3471_v38  ;;  %v3104_v38 = vpack.c.bf16 %v3044_v18, %v3043_v31  ;;  %v3049_v31 = vld [vmem:[#allocation4 + $0xc1] sm:$0xff] }
 0x14d   : > { %5170 = vmatprep.mubr.bf16.mxu1 %v3101_v40  ;;  %v5987_v61 = vpop.f32.mrf.mxu0 }
 0x14e   : > { %v5989_v62 = vpop.f32.mrf.mxu1 }
 0x14f   : > { %v5991_v3 = vpop.f32.mrf.mxu0 }
 0x150   : > { %v5993_v56 = vpop.f32.mrf.mxu1 }
 0x151   : > { %v5995_v24 = vpop.f32.mrf.mxu0 }
 0x152   : > { %v5997_v60 = vpop.f32.mrf.mxu1 }
 0x153   : > { %v4932_v54 = vpop.f32.mrf.mxu0  ;;  %5219 = vmatmul.mubr.bf16.vlgmr.msra.gmra.mxu0 %v3472_v17 }
 0x154   : > { %v4884_v12 = vpop.f32.mrf.mxu1  ;;  %5171 = vmatmul.mubr.bf16.vlgmr.msra.gmra.mxu1 %v3102_v8  ;;  %5222 = vmatprep.mubr.bf16.mxu0 %v3473_v19 }
 0x155   : > { %v1124_v51 = vadd.f32 %v4884_v12, %v5925_v36  ;;  %5174 = vmatprep.mubr.bf16.mxu1 %v3103_v5  ;;  %v1365_v15 = vpop.f32.mrf.mxu0  ;;  %v3048_v5 = vld [vmem:[#allocation4 + $0xb1] sm:$0xff] }
 0x156   : > { %v995_v45 = vpop.f32.mrf.mxu1 }
 0x157   : > { %v6000_v20 = vadd.f32 %v4932_v54, %v1124_v51  ;;  %v1122_v33 = vadd.f32 %v995_v45, %v5931_v34  ;;  %v4933_v40 = vpop.f32.mrf.mxu0  ;;  %v3047_v34 = vld [vmem:[#allocation4 + $0xa9] sm:$0xff]  ;;  %v3418_v54 = vld [vmem:[#allocation4 + $0xb2] sm:$0xff] }
 0x158   : > { %v4885_v57 = vpop.f32.mrf.mxu1  ;;  %v3106_v6 = vpack.c.bf16 %v3048_v5, %v3047_v34  ;;  %v3053_v34 = vld [vmem:[#allocation4 + $0xf1] sm:$0xff] }
 0x159   : > { %v6003_v35 = vadd.f32 %v1365_v15, %v1122_v33  ;;  %v1125_v36 = vadd.f32 %v4885_v57, %v5935_v53  ;;  %v1368_v63 = vpop.f32.mrf.mxu0  ;;  %v3417_v53 = vld [vmem:[#allocation4 + $0xaa] sm:$0xff]  ;;  %v3107_v57 = vpack.c.bf16 %v3050_v55, %v3049_v31 }
 0x15a   : > { %v998_v58 = vpop.f32.mrf.mxu1  ;;  %v3476_v27 = vpack.c.bf16 %v3418_v54, %v3417_v53  ;;  %v3054_v53 = vld [vmem:[#allocation4 + $0xf9] sm:$0xff] }
 0x15b   : > { %v6006_v52 = vadd.f32 %v4933_v40, %v1125_v36  ;;  %v1123_v39 = vadd.f32 %v998_v58, %v5939_v37  ;;  %v4936_v17 = vpop.f32.mrf.mxu0  ;;  %5223 = vmatmul.mubr.bf16.gmra.mxu0 %v3474_v48  ;;  %v3420_v37 = vld [vmem:[#allocation4 + $0xca] sm:$0xff]  ;;  %v3423_v54 = vld [vmem:[#allocation4 + $0xf2] sm:$0xff] }
 0x15c   : > { %v4888_v8 = vpop.f32.mrf.mxu1  ;;  %5175 = vmatmul.mubr.bf16.gmra.mxu1 %v3104_v38  ;;  %5226 = vmatprep.mubr.bf16.mxu0 %v3475_v50  ;;  %v3477_v40 = vpack.c.bf16 %v3420_v37, %v3419_v59 }
 0x15d   : > { %v6009_v19 = vadd.f32 %v1368_v63, %v1123_v39  ;;  %v1128_v12 = vadd.f32 %v4888_v8, %v5943_v28  ;;  %5178 = vmatprep.mubr.bf16.mxu1 %v3105_v49  ;;  %v1381_v51 = vpop.f32.mrf.mxu0  ;;  %v3052_v63 = vld [vmem:[#allocation4 + $0xe1] sm:$0xff] }
 0x15e   : > { %v1011_v18 = vpop.f32.mrf.mxu1 }
 0x15f   : > { %v6012_v10 = vadd.f32 %v4936_v17, %v1128_v12  ;;  %v1126_v45 = vadd.f32 %v1011_v18, %v5949_v0  ;;  %v4937_v16 = vpop.f32.mrf.mxu0  ;;  %v3051_v0 = vld [vmem:[#allocation4 + $0xd9] sm:$0xff]  ;;  %v3422_v17 = vld [vmem:[#allocation4 + $0xe2] sm:$0xff] }
 0x160   : > { %v4889_v15 = vpop.f32.mrf.mxu1  ;;  %v3108_v59 = vpack.c.bf16 %v3052_v63, %v3051_v0  ;;  %v3057_v0 = vld [vmem:[#allocation4 + $0x121] sm:$0xff] }
 0x161   : > { %v6015_v33 = vadd.f32 %v1381_v51, %v1126_v45  ;;  %v1129_v28 = vadd.f32 %v4889_v15, %v5953_v2  ;;  %v1384_v48 = vpop.f32.mrf.mxu0  ;;  %v3421_v2 = vld [vmem:[#allocation4 + $0xda] sm:$0xff]  ;;  %v3109_v15 = vpack.c.bf16 %v3054_v53, %v3053_v34 }
 0x162   : > { %v1014_v38 = vpop.f32.mrf.mxu1  ;;  %v3478_v37 = vpack.c.bf16 %v3422_v17, %v3421_v2  ;;  %v3058_v2 = vld [vmem:[#allocation4 + $0x129] sm:$0xff] }
 0x163   : > { %v6018_v36 = vadd.f32 %v4937_v16, %v1129_v28  ;;  %v1127_v49 = vadd.f32 %v1014_v38, %v5957_v11  ;;  %v4940_v58 = vpop.f32.mrf.mxu0  ;;  %5227 = vmatmul.mubr.bf16.gmra.mxu0 %v3476_v27  ;;  %v3424_v11 = vld [vmem:[#allocation4 + $0xfa] sm:$0xff]  ;;  %v3427_v17 = vld [vmem:[#allocation4 + $0x122] sm:$0xff] }
 0x164   : > { %v4892_v50 = vpop.f32.mrf.mxu1  ;;  %5179 = vmatmul.mubr.bf16.gmra.mxu1 %v3106_v6  ;;  %5230 = vmatprep.mubr.bf16.mxu0 %v3477_v40  ;;  %v3479_v16 = vpack.c.bf16 %v3424_v11, %v3423_v54 }
 0x165   : > { %v6021_v39 = vadd.f32 %v1384_v48, %v1127_v49  ;;  %v1132_v8 = vadd.f32 %v4892_v50, %v5961_v30  ;;  %5182 = vmatprep.mubr.bf16.mxu1 %v3107_v57  ;;  %v1397_v12 = vpop.f32.mrf.mxu0  ;;  %v3056_v48 = vld [vmem:[#allocation4 + $0x111] sm:$0xff] }
 0x166   : > { %v1027_v5 = vpop.f32.mrf.mxu1 }
 0x167   : > { %v6024_v31 = vadd.f32 %v4940_v58, %v1132_v8  ;;  %v1130_v18 = vadd.f32 %v1027_v5, %v5968_v23  ;;  %v4941_v55 = vpop.f32.mrf.mxu0  ;;  %v3055_v23 = vld [vmem:[#allocation4 + $0x109] sm:$0xff]  ;;  %v3426_v58 = vld [vmem:[#allocation4 + $0x112] sm:$0xff] }
 0x168   : > { %v4893_v51 = vpop.f32.mrf.mxu1  ;;  %v3110_v54 = vpack.c.bf16 %v3056_v48, %v3055_v23  ;;  %v3061_v23 = vld [vmem:[#allocation4 + $0x151] sm:$0xff] }
 0x169   : > { %v6027_v45 = vadd.f32 %v1397_v12, %v1130_v18  ;;  %v1133_v30 = vadd.f32 %v4893_v51, %v5972_v29  ;;  %v1400_v27 = vpop.f32.mrf.mxu0  ;;  %v3425_v29 = vld [vmem:[#allocation4 + $0x10a] sm:$0xff]  ;;  %v3111_v51 = vpack.c.bf16 %v3058_v2, %v3057_v0 }
 0x16a   : > { %v1030_v6 = vpop.f32.mrf.mxu1  ;;  %v3480_v11 = vpack.c.bf16 %v3426_v58, %v3425_v29  ;;  %v3062_v29 = vld [vmem:[#allocation4 + $0x159] sm:$0xff] }
 0x16b   : > { %v6030_v28 = vadd.f32 %v4941_v55, %v1133_v30  ;;  %v1131_v57 = vadd.f32 %v1030_v6, %v5978_v43  ;;  %v4944_v38 = vpop.f32.mrf.mxu0  ;;  %5231 = vmatmul.mubr.bf16.gmra.mxu0 %v3478_v37  ;;  %v3428_v43 = vld [vmem:[#allocation4 + $0x12a] sm:$0xff]  ;;  %v3431_v58 = vld [vmem:[#allocation4 + $0x152] sm:$0xff] }
 0x16c   : > { %v4896_v40 = vpop.f32.mrf.mxu1  ;;  %5183 = vmatmul.mubr.bf16.gmra.mxu1 %v3108_v59  ;;  %5234 = vmatprep.mubr.bf16.mxu0 %v3479_v16  ;;  %v3481_v55 = vpack.c.bf16 %v3428_v43, %v3427_v17 }
 0x16d   : > { %v6033_v49 = vadd.f32 %v1400_v27, %v1131_v57  ;;  %v1136_v50 = vadd.f32 %v4896_v40, %v5982_v46  ;;  %5186 = vmatprep.mubr.bf16.mxu1 %v3109_v15  ;;  %v1413_v8 = vpop.f32.mrf.mxu0  ;;  %v3060_v27 = vld [vmem:[#allocation4 + $0x141] sm:$0xff] }
 0x16e   : > { %v1043_v63 = vpop.f32.mrf.mxu1 }
 0x16f   : > { %v6036_v34 = vadd.f32 %v4944_v38, %v1136_v50  ;;  %v1134_v5 = vadd.f32 %v1043_v63, %v5987_v61  ;;  %v4945_v53 = vpop.f32.mrf.mxu0  ;;  %v3059_v61 = vld [vmem:[#allocation4 + $0x139] sm:$0xff]  ;;  %v3430_v38 = vld [vmem:[#allocation4 + $0x142] sm:$0xff] }
 0x170   : > { %v4897_v12 = vpop.f32.mrf.mxu1  ;;  %v3112_v17 = vpack.c.bf16 %v3060_v27, %v3059_v61 }
 0x171   : > { %v6039_v18 = vadd.f32 %v1413_v8, %v1134_v5  ;;  %v1137_v46 = vadd.f32 %v4897_v12, %v5991_v3  ;;  %v1416_v37 = vpop.f32.mrf.mxu0  ;;  %v3429_v3 = vld [vmem:[#allocation4 + $0x13a] sm:$0xff]  ;;  %v3113_v12 = vpack.c.bf16 %v3062_v29, %v3061_v23 }
 0x172   : > { %v1046_v59 = vpop.f32.mrf.mxu1  ;;  %v3482_v43 = vpack.c.bf16 %v3430_v38, %v3429_v3 }
 0x173   : > { %v6042_v30 = vadd.f32 %v4945_v53, %v1137_v46  ;;  %v1135_v15 = vadd.f32 %v1046_v59, %v5995_v24  ;;  %v4948_v6 = vpop.f32.mrf.mxu0  ;;  %5235 = vmatmul.mubr.bf16.gmra.mxu0 %v3480_v11  ;;  %v3432_v24 = vld [vmem:[#allocation4 + $0x15a] sm:$0xff] }
 0x174   : > { %v4900_v16 = vpop.f32.mrf.mxu1  ;;  %5187 = vmatmul.mubr.bf16.gmra.mxu1 %v3110_v54  ;;  %5238 = vmatprep.mubr.bf16.mxu0 %v3481_v55  ;;  %v3483_v53 = vpack.c.bf16 %v3432_v24, %v3431_v58 }
 0x175   : > { %v6045_v57 = vadd.f32 %v1416_v37, %v1135_v15  ;;  %v1140_v40 = vadd.f32 %v4900_v16, %v5927_v21  ;;  %5190 = vmatprep.mubr.bf16.mxu1 %v3111_v51  ;;  %v1429_v50 = vpop.f32.mrf.mxu0  ;;  %v3433_v16 = vld [vmem:[#allocation4 + $0x16a] sm:$0xff] }
 0x176   : > { %v1059_v48 = vpop.f32.mrf.mxu1 }
 0x177   : > { %v6048_v0 = vadd.f32 %v4948_v6, %v1140_v40  ;;  %v1138_v63 = vadd.f32 %v1059_v48, %v5933_v41  ;;  %v4949_v2 = vpop.f32.mrf.mxu0  ;;  %v3063_v41 = vld [vmem:[#allocation4 + $0x169] sm:$0xff]  ;;  %v3434_v6 = vld [vmem:[#allocation4 + $0x172] sm:$0xff] }
 0x178   : > { %v4901_v8 = vpop.f32.mrf.mxu1  ;;  %v3484_v48 = vpack.c.bf16 %v3434_v6, %v3433_v16 }
 0x179   : > { %v6051_v5 = vadd.f32 %v1429_v50, %v1138_v63  ;;  %v1141_v21 = vadd.f32 %v4901_v8, %v5937_v9  ;;  %v1432_v11 = vpop.f32.mrf.mxu0  ;;  %v3064_v9 = vld [vmem:[#allocation4 + $0x171] sm:$0xff] }
 0x17a   : > { %v1062_v54 = vpop.f32.mrf.mxu1  ;;  %v3114_v23 = vpack.c.bf16 %v3064_v9, %v3063_v41 }
 0x17b   : > { %v6054_v46 = vadd.f32 %v4949_v2, %v1141_v21  ;;  %v1139_v51 = vadd.f32 %v1062_v54, %v5941_v14  ;;  %v4952_v59 = vpop.f32.mrf.mxu0  ;;  %5239 = vmatmul.mubr.bf16.gmra.mxu0 %v3482_v43  ;;  %v3437_v21 = vld [vmem:[#allocation4 + $0x19a] sm:$0xff] }
 0x17c   : > { %v4904_v55 = vpop.f32.mrf.mxu1  ;;  %5191 = vmatmul.mubr.bf16.gmra.mxu1 %v3112_v17  ;;  %5242 = vmatprep.mubr.bf16.mxu0 %v3483_v53  ;;  %v3067_v17 = vld [vmem:[#allocation4 + $0x199] sm:$0xff] }
 0x17d   : > { %v6057_v37 = vadd.f32 %v1432_v11, %v1139_v51  ;;  %v1144_v15 = vadd.f32 %v4904_v55, %v5945_v42  ;;  %5194 = vmatprep.mubr.bf16.mxu1 %v3113_v12  ;;  %v1445_v27 = vpop.f32.mrf.mxu0  ;;  %v3438_v12 = vld [vmem:[#allocation4 + $0x1a2] sm:$0xff] }
 0x17e   : > { %v1075_v61 = vpop.f32.mrf.mxu1  ;;  %v3486_v41 = vpack.c.bf16 %v3438_v12, %v3437_v21 }
 0x17f   : > { %v6060_v40 = vadd.f32 %v4952_v59, %v1144_v15  ;;  %v1142_v14 = vadd.f32 %v1075_v61, %v5951_v1  ;;  %v4953_v38 = vpop.f32.mrf.mxu0 }
 0x180   : > { %v4905_v3 = vpop.f32.mrf.mxu1 }
 0x181   : > { %v6063_v50 = vadd.f32 %v1445_v27, %v1142_v14  ;;  %v1145_v29 = vadd.f32 %v4905_v3, %v5955_v7  ;;  %v1448_v58 = vpop.f32.mrf.mxu0  ;;  %v3068_v7 = vld [vmem:[#allocation4 + $0x1a1] sm:$0xff] }
 0x182   : > { %v1078_v42 = vpop.f32.mrf.mxu1  ;;  %v3116_v59 = vpack.c.bf16 %v3068_v7, %v3067_v17 }
 0x183   : > { %v6066_v24 = vadd.f32 %v4953_v38, %v1145_v29  ;;  %v1143_v63 = vadd.f32 %v1078_v42, %v5959_v13  ;;  %v4956_v2 = vpop.f32.mrf.mxu0  ;;  %5243 = vmatmul.mubr.bf16.gmra.mxu0 %v3484_v48 }
 0x184   : > { %v4908_v8 = vpop.f32.mrf.mxu1  ;;  %5195 = vmatmul.mubr.bf16.gmra.mxu1 %v3114_v23  ;;  %5246 = vmatprep.mubr.bf16.mxu0 %v5976_v47 }
 0x185   : > { %v6069_v1 = vadd.f32 %v1448_v58, %v1143_v63  ;;  %v1148_v43 = vadd.f32 %v4908_v8, %v5963_v4  ;;  %5198 = vmatprep.mubr.bf16.mxu1 %v5912_v25  ;;  %v1461_v54 = vpop.f32.mrf.mxu0 }
 0x186   : > { %v1091_v53 = vpop.f32.mrf.mxu1 }
 0x187   : > { %v6074_v11 = vadd.f32 %v4956_v2, %v1148_v43  ;;  %v1146_v13 = vadd.f32 %v1091_v53, %v5970_v26  ;;  %v4957_v55 = vpop.f32.mrf.mxu0 }
 0x188   : > { %v4909_v51 = vpop.f32.mrf.mxu1 }
 0x189   : > { %v6077_v15 = vadd.f32 %v1461_v54, %v1146_v13  ;;  %v1149_v4 = vadd.f32 %v4909_v51, %v5974_v32  ;;  %v1464_v9 = vpop.f32.mrf.mxu0 }
 0x18a   : > { %v1094_v25 = vpop.f32.mrf.mxu1 }
 0x18b   : > { %v6080_v47 = vadd.f32 %v4957_v55, %v1149_v4  ;;  %v1147_v16 = vadd.f32 %v1094_v25, %v5980_v44  ;;  %v4960_v61 = vpop.f32.mrf.mxu0  ;;  %5247 = vmatmul.mubr.bf16.gmra.mxu0 %v3486_v41 }
 0x18c   : > { %v4912_v6 = vpop.f32.mrf.mxu1  ;;  %5199 = vmatmul.mubr.bf16.gmra.mxu1 %v3116_v59 }
 0x18d   : > { %v6083_v27 = vadd.f32 %v1464_v9, %v1147_v16  ;;  %v1152_v26 = vadd.f32 %v4912_v6, %v5984_v22  ;;  %v1477_v3 = vpop.f32.mrf.mxu0 }
 0x18e   : > { %v1107_v14 = vpop.f32.mrf.mxu1 }
 0x18f   : > { %v6086_v38 = vadd.f32 %v4960_v61, %v1152_v26  ;;  %v1150_v32 = vadd.f32 %v1107_v14, %v5989_v62  ;;  %v4961_v48 = vpop.f32.mrf.mxu0 }
 0x190   : > { %v4913_v23 = vpop.f32.mrf.mxu1 }
 0x191   : > { %v6089_v29 = vadd.f32 %v1477_v3, %v1150_v32  ;;  %v1153_v44 = vadd.f32 %v4913_v23, %v5993_v56  ;;  %v1480_v58 = vpop.f32.mrf.mxu0 }
 0x192   : > { %v1110_v42 = vpop.f32.mrf.mxu1 }
 0x193   : > { %v6092_v63 = vadd.f32 %v4961_v48, %v1153_v44  ;;  %v1151_v8 = vadd.f32 %v1110_v42, %v5997_v60  ;;  %v5028_v22 = vpop.f32.mrf.mxu0 }
 0x194   : > { %v4980_v2 = vpop.f32.mrf.mxu1 }
 0x195   : > { %v6095_v17 = vadd.f32 %v1480_v58, %v1151_v8  ;;  %v1864_v43 = vadd.f32 %v4980_v2, %v6000_v20  ;;  %v2105_v62 = vpop.f32.mrf.mxu0 }
 0x196   : > { %v1735_v7 = vpop.f32.mrf.mxu1 }
 0x197   : > { %v6098_v21 = vadd.f32 %v5028_v22, %v1864_v43  ;;  %v1862_v12 = vadd.f32 %v1735_v7, %v6003_v35  ;;  %v5029_v56 = vpop.f32.mrf.mxu0 }
 0x198   : > { %v4981_v53 = vpop.f32.mrf.mxu1 }
 0x199   : > { %v6101_v54 = vadd.f32 %v2105_v62, %v1862_v12  ;;  %v1865_v13 = vadd.f32 %v4981_v53, %v6006_v52  ;;  %v2108_v60 = vpop.f32.mrf.mxu0 }
 0x19a   : > { %v1738_v51 = vpop.f32.mrf.mxu1 }
 0x19b   : > { %v6104_v55 = vadd.f32 %v5029_v56, %v1865_v13  ;;  %v1863_v59 = vadd.f32 %v1738_v51, %v6009_v19  ;;  %v5032_v20 = vpop.f32.mrf.mxu0 }
 0x19c   : > { %v4984_v41 = vpop.f32.mrf.mxu1 }
 0x19d   : > { %v6107_v4 = vadd.f32 %v2108_v60, %v1863_v59  ;;  %v1868_v25 = vadd.f32 %v4984_v41, %v6012_v10  ;;  %v2121_v35 = vpop.f32.mrf.mxu0 }
 0x19e   : > { %v1751_v9 = vpop.f32.mrf.mxu1 }
 0x19f   : > { %v6110_v16 = vadd.f32 %v5032_v20, %v1868_v25  ;;  %v1866_v6 = vadd.f32 %v1751_v9, %v6015_v33  ;;  %v5033_v52 = vpop.f32.mrf.mxu0 }
 0x1a0   : > { %v4985_v61 = vpop.f32.mrf.mxu1 }
 0x1a1   : > { %v6113_v26 = vadd.f32 %v2121_v35, %v1866_v6  ;;  %v1869_v14 = vadd.f32 %v4985_v61, %v6018_v36  ;;  %v2124_v19 = vpop.f32.mrf.mxu0 }
 0x1a2   : > { %v1754_v3 = vpop.f32.mrf.mxu1 }
 0x1a3   : > { %v6116_v32 = vadd.f32 %v5033_v52, %v1869_v14  ;;  %v1867_v23 = vadd.f32 %v1754_v3, %v6021_v39  ;;  %v5036_v10 = vpop.f32.mrf.mxu0 }
 0x1a4   : > { %v4988_v48 = vpop.f32.mrf.mxu1 }
 0x1a5   : > { %v6119_v44 = vadd.f32 %v2124_v19, %v1867_v23  ;;  %v1872_v42 = vadd.f32 %v4988_v48, %v6024_v31  ;;  %v2137_v33 = vpop.f32.mrf.mxu0 }
 0x1a6   : > { %v1767_v58 = vpop.f32.mrf.mxu1 }
 0x1a7   : > { %v6122_v8 = vadd.f32 %v5036_v10, %v1872_v42  ;;  %v1870_v2 = vadd.f32 %v1767_v58, %v6027_v45  ;;  %v5037_v36 = vpop.f32.mrf.mxu0 }
 0x1a8   : > { %v4989_v22 = vpop.f32.mrf.mxu1 }
 0x1a9   : > { %v6125_v43 = vadd.f32 %v2137_v33, %v1870_v2  ;;  %v1873_v7 = vadd.f32 %v4989_v22, %v6030_v28  ;;  %v2140_v39 = vpop.f32.mrf.mxu0 }
 0x1aa   : > { %v1770_v62 = vpop.f32.mrf.mxu1 }
 0x1ab   : > { %v6128_v12 = vadd.f32 %v5037_v36, %v1873_v7  ;;  %v1871_v53 = vadd.f32 %v1770_v62, %v6033_v49  ;;  %v5040_v31 = vpop.f32.mrf.mxu0 }
 0x1ac   : > { %v4992_v56 = vpop.f32.mrf.mxu1 }
 0x1ad   : > { %v6131_v13 = vadd.f32 %v2140_v39, %v1871_v53  ;;  %v1876_v51 = vadd.f32 %v4992_v56, %v6036_v34  ;;  %v2153_v45 = vpop.f32.mrf.mxu0 }
 0x1ae   : > { %v1783_v60 = vpop.f32.mrf.mxu1 }
 0x1af   : > { %v6134_v59 = vadd.f32 %v5040_v31, %v1876_v51  ;;  %v1874_v41 = vadd.f32 %v1783_v60, %v6039_v18  ;;  %v5041_v28 = vpop.f32.mrf.mxu0 }
 0x1b0   : > { %v4993_v20 = vpop.f32.mrf.mxu1 }
 0x1b1   : > { %v6137_v25 = vadd.f32 %v2153_v45, %v1874_v41  ;;  %v1877_v9 = vadd.f32 %v4993_v20, %v6042_v30  ;;  %v2156_v49 = vpop.f32.mrf.mxu0 }
 0x1b2   : > { %v1786_v35 = vpop.f32.mrf.mxu1 }
 0x1b3   : > { %v6140_v6 = vadd.f32 %v5041_v28, %v1877_v9  ;;  %v1875_v61 = vadd.f32 %v1786_v35, %v6045_v57  ;;  %v5044_v34 = vpop.f32.mrf.mxu0 }
 0x1b4   : > { %v4996_v52 = vpop.f32.mrf.mxu1 }
 0x1b5   : > { %v6143_v14 = vadd.f32 %v2156_v49, %v1875_v61  ;;  %v1880_v3 = vadd.f32 %v4996_v52, %v6048_v0  ;;  %v2169_v18 = vpop.f32.mrf.mxu0 }
 0x1b6   : > { %v1799_v19 = vpop.f32.mrf.mxu1 }
 0x1b7   : > { %v6146_v23 = vadd.f32 %v5044_v34, %v1880_v3  ;;  %v1878_v48 = vadd.f32 %v1799_v19, %v6051_v5  ;;  %v5045_v30 = vpop.f32.mrf.mxu0 }
 0x1b8   : > { %v4997_v10 = vpop.f32.mrf.mxu1 }
 0x1b9   : > { %v6149_v42 = vadd.f32 %v2169_v18, %v1878_v48  ;;  %v1881_v58 = vadd.f32 %v4997_v10, %v6054_v46  ;;  %v2172_v57 = vpop.f32.mrf.mxu0 }
 0x1ba   : > { %v1802_v33 = vpop.f32.mrf.mxu1 }
 0x1bb   : > { %v6152_v2 = vadd.f32 %v5045_v30, %v1881_v58  ;;  %v1879_v22 = vadd.f32 %v1802_v33, %v6057_v37  ;;  %v5048_v0 = vpop.f32.mrf.mxu0 }
 0x1bc   : > { %v5000_v36 = vpop.f32.mrf.mxu1 }
 0x1bd   : > { %v6155_v7 = vadd.f32 %v2172_v57, %v1879_v22  ;;  %v1884_v62 = vadd.f32 %v5000_v36, %v6060_v40  ;;  %v2185_v5 = vpop.f32.mrf.mxu0 }
 0x1be   : > { %v1815_v39 = vpop.f32.mrf.mxu1 }
 0x1bf   : > { %v6158_v53 = vadd.f32 %v5048_v0, %v1884_v62  ;;  %v1882_v56 = vadd.f32 %v1815_v39, %v6063_v50  ;;  %v5049_v46 = vpop.f32.mrf.mxu0 }
 0x1c0   : > { %v5001_v31 = vpop.f32.mrf.mxu1 }
 0x1c1   : > { %v6161_v51 = vadd.f32 %v2185_v5, %v1882_v56  ;;  %v1885_v60 = vadd.f32 %v5001_v31, %v6066_v24  ;;  %v2188_v37 = vpop.f32.mrf.mxu0 }
 0x1c2   : > { %v1818_v45 = vpop.f32.mrf.mxu1 }
 0x1c3   : > { %v6164_v41 = vadd.f32 %v5049_v46, %v1885_v60  ;;  %v1883_v20 = vadd.f32 %v1818_v45, %v6069_v1  ;;  %v5052_v40 = vpop.f32.mrf.mxu0 }
 0x1c4   : > { %v5004_v28 = vpop.f32.mrf.mxu1 }
 0x1c5   : > { %v6167_v9 = vadd.f32 %v2188_v37, %v1883_v20  ;;  %v1888_v35 = vadd.f32 %v5004_v28, %v6074_v11  ;;  %v2201_v50 = vpop.f32.mrf.mxu0 }
 0x1c6   : > { %v1831_v49 = vpop.f32.mrf.mxu1 }
 0x1c7   : > { %v6170_v61 = vadd.f32 %v5052_v40, %v1888_v35  ;;  %v1886_v52 = vadd.f32 %v1831_v49, %v6077_v15  ;;  %v5053_v24 = vpop.f32.mrf.mxu0 }
 0x1c8   : > { %v5005_v34 = vpop.f32.mrf.mxu1 }
 0x1c9   : > { %v6173_v3 = vadd.f32 %v2201_v50, %v1886_v52  ;;  %v1889_v19 = vadd.f32 %v5005_v34, %v6080_v47  ;;  %v2204_v1 = vpop.f32.mrf.mxu0 }
 0x1ca   : > { %v1834_v18 = vpop.f32.mrf.mxu1 }
 0x1cb   : > { %v6176_v48 = vadd.f32 %v5053_v24, %v1889_v19  ;;  %v1887_v10 = vadd.f32 %v1834_v18, %v6083_v27  ;;  %v5056_v11 = vpop.f32.mrf.mxu0 }
 0x1cc   : > { %v5008_v30 = vpop.f32.mrf.mxu1 }
 0x1cd   : > { %6533 = vst [vmem:[#allocation14_spill] sm:$0xff] %v6176_v48  ;;  %v6179_v58 = vadd.f32 %v2204_v1, %v1887_v10  ;;  %v1892_v33 = vadd.f32 %v5008_v30, %v6086_v38  ;;  %v2217_v15 = vpop.f32.mrf.mxu0 }
 0x1ce   : > { %v1847_v57 = vpop.f32.mrf.mxu1 }
 0x1cf   : > { %6534 = vst [vmem:[#allocation15_spill] sm:$0xff] %v6179_v58  ;;  %v6182_v22 = vadd.f32 %v5056_v11, %v1892_v33  ;;  %v1890_v36 = vadd.f32 %v1847_v57, %v6089_v29  ;;  %v5057_v47 = vpop.f32.mrf.mxu0 }
 0x1d0   : > { %v5009_v0 = vpop.f32.mrf.mxu1 }
 0x1d1   : > { %v6185_v62 = vadd.f32 %v2217_v15, %v1890_v36  ;;  %v1893_v39 = vadd.f32 %v5009_v0, %v6092_v63  ;;  %v2220_v27 = vpop.f32.mrf.mxu0 }
 0x1d2   : > { %v1850_v5 = vpop.f32.mrf.mxu1 }
 0x1d3   : > { %v6188_v56 = vadd.f32 %v5057_v47, %v1893_v39  ;;  %v1891_v31 = vadd.f32 %v1850_v5, %v6095_v17  ;;  %v5124_v38 = vpop.f32.mrf.mxu0 }
 0x1d4   : > { %v5076_v46 = vpop.f32.mrf.mxu1 }
 0x1d5   : > { %6535 = vst [vmem:[#allocation16_spill] sm:$0xff] %v6188_v56  ;;  %v6191_v60 = vadd.f32 %v2220_v27, %v1891_v31  ;;  %v2604_v45 = vadd.f32 %v5076_v46, %v6098_v21  ;;  %v2846_v29 = vpop.f32.mrf.mxu0 }
 0x1d6   : > { %v2475_v37 = vpop.f32.mrf.mxu1 }
 0x1d7   : > { %6536 = vst [vmem:[#allocation17_spill] sm:$0xff] %v6191_v60  ;;  %v6194_v20 = vadd.f32 %v5124_v38, %v2604_v45  ;;  %v2602_v28 = vadd.f32 %v2475_v37, %v6101_v54  ;;  %v6199_v63 = vpop.f32.mrf.mxu0 }
 0x1d8   : > { %v6197_v40 = vpop.f32.mrf.mxu1 }
 0x1d9   : > { %v6201_v35 = vadd.f32 %v2846_v29, %v2602_v28  ;;  %v6205_v17 = vpop.f32.mrf.mxu0 }
 0x1da   : > { %v6203_v49 = vpop.f32.mrf.mxu1 }
 0x1db   : > { %v5128_v52 = vpop.f32.mrf.mxu0 }
 0x1dc   : > { %v5080_v50 = vpop.f32.mrf.mxu1 }
 0x1dd   : > { %v2608_v21 = vadd.f32 %v5080_v50, %v6110_v16  ;;  %v2862_v24 = vpop.f32.mrf.mxu0 }
 0x1de   : > { %v2491_v34 = vpop.f32.mrf.mxu1 }
 0x1df   : > { %v6208_v19 = vadd.f32 %v5128_v52, %v2608_v21  ;;  %v2606_v54 = vadd.f32 %v2491_v34, %v6113_v26  ;;  %v6213_v1 = vpop.f32.mrf.mxu0 }
 0x1e0   : > { %v6211_v18 = vpop.f32.mrf.mxu1 }
 0x1e1   : > { %v6215_v10 = vadd.f32 %v2862_v24, %v2606_v54  ;;  %v6219_v11 = vpop.f32.mrf.mxu0 }
 0x1e2   : > { %v6217_v30 = vpop.f32.mrf.mxu1 }
 0x1e3   : > { %v5132_v57 = vpop.f32.mrf.mxu0 }
 0x1e4   : > { %v5084_v33 = vpop.f32.mrf.mxu1 }
 0x1e5   : > { %v2612_v16 = vadd.f32 %v5084_v33, %v6122_v8  ;;  %v2878_v36 = vpop.f32.mrf.mxu0 }
 0x1e6   : > { %v2507_v15 = vpop.f32.mrf.mxu1 }
 0x1e7   : > { %v6222_v0 = vadd.f32 %v5132_v57, %v2612_v16  ;;  %v2610_v26 = vadd.f32 %v2507_v15, %v6125_v43  ;;  %v6227_v39 = vpop.f32.mrf.mxu0 }
 0x1e8   : > { %v6225_v47 = vpop.f32.mrf.mxu1 }
 0x1e9   : > { %v6229_v5 = vadd.f32 %v2878_v36, %v2610_v26  ;;  %v6233_v31 = vpop.f32.mrf.mxu0 }
 0x1ea   : > { %v6231_v27 = vpop.f32.mrf.mxu1 }
 0x1eb   : > { %v5136_v38 = vpop.f32.mrf.mxu0 }
 0x1ec   : > { %v5088_v46 = vpop.f32.mrf.mxu1 }
 0x1ed   : > { %v2616_v8 = vadd.f32 %v5088_v46, %v6134_v59  ;;  %v2894_v37 = vpop.f32.mrf.mxu0 }
 0x1ee   : > { %v2523_v45 = vpop.f32.mrf.mxu1 }
 0x1ef   : > { %v6236_v29 = vadd.f32 %v5136_v38, %v2616_v8  ;;  %v2614_v43 = vadd.f32 %v2523_v45, %v6137_v25  ;;  %v6241_v50 = vpop.f32.mrf.mxu0 }
 0x1f0   : > { %v6239_v28 = vpop.f32.mrf.mxu1 }
 0x1f1   : > { %v6243_v52 = vadd.f32 %v2894_v37, %v2614_v43  ;;  %v6247_v34 = vpop.f32.mrf.mxu0 }
 0x1f2   : > { %v6245_v21 = vpop.f32.mrf.mxu1 }
 0x1f3   : > { %v5140_v54 = vpop.f32.mrf.mxu0 }
 0x1f4   : > { %v5092_v24 = vpop.f32.mrf.mxu1 }
 0x1f5   : > { %v2620_v59 = vadd.f32 %v5092_v24, %v6146_v23  ;;  %v2910_v57 = vpop.f32.mrf.mxu0 }
 0x1f6   : > { %v2539_v33 = vpop.f32.mrf.mxu1 }
 0x1f7   : > { %v6250_v16 = vadd.f32 %v5140_v54, %v2620_v59  ;;  %v2618_v25 = vadd.f32 %v2539_v33, %v6149_v42  ;;  %v6255_v36 = vpop.f32.mrf.mxu0 }
 0x1f8   : > { %v6253_v15 = vpop.f32.mrf.mxu1 }
 0x1f9   : > { %v6257_v26 = vadd.f32 %v2910_v57, %v2618_v25  ;;  %v6261_v38 = vpop.f32.mrf.mxu0 }
 0x1fa   : > { %v6259_v46 = vpop.f32.mrf.mxu1 }
 0x1fb   : > { %v5144_v45 = vpop.f32.mrf.mxu0 }
 0x1fc   : > { %v5096_v8 = vpop.f32.mrf.mxu1 }
 0x1fd   : > { %v2624_v23 = vadd.f32 %v5096_v8, %v6158_v53  ;;  %v2926_v43 = vpop.f32.mrf.mxu0 }
 0x1fe   : > { %v2555_v37 = vpop.f32.mrf.mxu1 }
 0x1ff   : > { %v6264_v24 = vadd.f32 %v5144_v45, %v2624_v23  ;;  %v2622_v42 = vadd.f32 %v2555_v37, %v6161_v51  ;;  %v6269_v59 = vpop.f32.mrf.mxu0 }
 0x200   : > { %v6267_v54 = vpop.f32.mrf.mxu1  ;;  %6537 = vst [vmem:[#allocation18_spill] sm:$0xff] %v6269_v59 }
 0x201   : > { %v6271_v33 = vadd.f32 %v2926_v43, %v2622_v42  ;;  %v6275_v25 = vpop.f32.mrf.mxu0 }
 0x202   : > { %v6273_v57 = vpop.f32.mrf.mxu1  ;;  %6539 = vst [vmem:[#allocation20_spill] sm:$0xff] %v6275_v25 }
 0x203   : > { %6538 = vst [vmem:[#allocation19_spill] sm:$0xff] %v6271_v33  ;;  %v5148_v56 = vpop.f32.mrf.mxu0 }
 0x204   : > { %v5100_v60 = vpop.f32.mrf.mxu1 }
 0x205   : > { %v2628_v53 = vadd.f32 %v5100_v60, %v6170_v61  ;;  %v2942_v58 = vpop.f32.mrf.mxu0 }
 0x206   : > { %v2571_v8 = vpop.f32.mrf.mxu1 }
 0x207   : > { %v6278_v45 = vadd.f32 %v5148_v56, %v2628_v53  ;;  %v2626_v51 = vadd.f32 %v2571_v8, %v6173_v3  ;;  %v6283_v37 = vpop.f32.mrf.mxu0 }
 0x208   : > { %v6281_v23 = vpop.f32.mrf.mxu1 }
 0x209   : > { %v6285_v43 = vadd.f32 %v2942_v58, %v2626_v51  ;;  %v6289_v48 = vpop.f32.mrf.mxu0 }
 0x20a   : > { %v6287_v42 = vpop.f32.mrf.mxu1  ;;  %6541 = vst [vmem:[#allocation22_spill] sm:$0xff] %v6289_v48  ;;  %v2605_v48 = vadd.f32 %v6197_v40, %v6104_v55 }
 0x20b   : > { %6540 = vst [vmem:[#allocation21_spill] sm:$0xff] %v6285_v43  ;;  %v5152_v33 = vpop.f32.mrf.mxu0 }
 0x20c   : > { %v5104_v25 = vpop.f32.mrf.mxu1 }
 0x20d   : > { %v2632_v61 = vadd.f32 %v5104_v25, %v6182_v22  ;;  %v2958_v59 = vpop.f32.mrf.mxu0 }
 0x20e   : > { %v2587_v60 = vpop.f32.mrf.mxu1 }
 0x20f   : > { %v6292_v56 = vadd.f32 %v5152_v33, %v2632_v61  ;;  %v2630_v3 = vadd.f32 %v2587_v60, %v6185_v62  ;;  %v6297_v8 = vpop.f32.mrf.mxu0  ;;  %v2603_v33 = vadd.f32 %v6203_v49, %v6107_v4 }
 0x210   : > { %v6295_v53 = vpop.f32.mrf.mxu1  ;;  %6543 = vst [vmem:[#allocation24_spill] sm:$0xff] %v6297_v8  ;;  %v2976_v8 = vadd.f32 %v6199_v63, %v2605_v48  ;;  %v2609_v63 = vadd.f32 %v6211_v18, %v6116_v32 }
 0x211   : > { %6542 = vst [vmem:[#allocation23_spill] sm:$0xff] %v6292_v56  ;;  %v6299_v58 = vadd.f32 %v2958_v59, %v2630_v3  ;;  %v6303_v43 = vpop.f32.mrf.mxu0 }
 0x212   : > { %v6301_v51 = vpop.f32.mrf.mxu1  ;;  %6546 = vst [vmem:[#allocation27_spill] sm:$0xff] %v6303_v43  ;;  %v6315_v43 = vld [vmem:[%s6515_s2] ss:$0 sm:$0xff] }
 0x213   : > { %6544 = vst [vmem:[#allocation25_spill] sm:$0xff] %v6299_v58  ;;  %6545 = vst [vmem:[#allocation26_spill] sm:$0xff] %v6301_v51  ;;  %v5220_v25 = vpop.f32.mrf.mxu0  ;;  %v2974_v58 = vadd.f32 %v6205_v17, %v2603_v33 }
 0x214   : > { %v5172_v22 = vpop.f32.mrf.mxu1 }
 0x215   : > { %v3345_v62 = vadd.f32 %v5172_v22, %v6194_v20  ;;  %v3586_v60 = vpop.f32.mrf.mxu0 }
 0x216   : > { %v3216_v61 = vpop.f32.mrf.mxu1 }
 0x217   : > { %v3715_v59 = vadd.f32 %v5220_v25, %v3345_v62  ;;  %v3343_v3 = vadd.f32 %v3216_v61, %v6201_v35  ;;  %v5221_v40 = vpop.f32.mrf.mxu0  ;;  %v2607_v35 = vadd.f32 %v6217_v30, %v6119_v44  ;;  %v6326_v25 = vld [vmem:[%s6516_s3] ss:$0 sm:$0xff] }
 0x218   : > { %v5173_v55 = vpop.f32.mrf.mxu1 }
 0x219   : > { %v3713_v56 = vadd.f32 %v3586_v60, %v3343_v3  ;;  %v3346_v4 = vadd.f32 %v5173_v55, %v2976_v8  ;;  %v3589_v20 = vpop.f32.mrf.mxu0  ;;  %v3818_v22 = vmul.f32 %v6315_v43, %v3715_v59  ;;  %v2980_v3 = vadd.f32 %v6213_v1, %v2609_v63 }
 0x21a   : > { %v3219_v49 = vpop.f32.mrf.mxu1 }
 0x21b   : > { %v3716_v51 = vadd.f32 %v5221_v40, %v3346_v4  ;;  %v3344_v48 = vadd.f32 %v3219_v49, %v2974_v58  ;;  %v5224_v33 = vpop.f32.mrf.mxu0  ;;  %v3816_v8 = vmul.f32 %v6315_v43, %v3713_v56  ;;  %v3857_v32 = vadd.f32 %v6326_v25, %v3818_v22 }
 0x21c   : > { %v5176_v17 = vpop.f32.mrf.mxu1  ;;  %v2978_v56 = vadd.f32 %v6219_v11, %v2607_v35 }
 0x21d   : > { %v3819_v62 = vmul.f32 %v6315_v43, %v3716_v51  ;;  %v3714_v61 = vadd.f32 %v3589_v20, %v3344_v48  ;;  %v3349_v58 = vadd.f32 %v5176_v17, %v6208_v19  ;;  %v3602_v59 = vpop.f32.mrf.mxu0  ;;  %v3855_v19 = vadd.f32 %v6326_v25, %v3816_v8 }
 0x21e   : > { %v3232_v60 = vpop.f32.mrf.mxu1 }
 0x21f   : > { %v3858_v44 = vadd.f32 %v6326_v25, %v3819_v62  ;;  %v3817_v18 = vmul.f32 %v6315_v43, %v3714_v61  ;;  %v3347_v30 = vadd.f32 %v3232_v60, %v6215_v10  ;;  %v3719_v55 = vadd.f32 %v5224_v33, %v3349_v58  ;;  %v5225_v40 = vpop.f32.mrf.mxu0 }
 0x220   : > { %v5177_v51 = vpop.f32.mrf.mxu1  ;;  %v2613_v62 = vadd.f32 %v6225_v47, %v6128_v12  ;;  %v2611_v12 = vadd.f32 %v6231_v27, %v6131_v13 }
 0x221   : > { %v4500_v4 = vpack.c.bf16 %v3858_v44, %v3857_v32  ;;  %v3856_v49 = vadd.f32 %v6326_v25, %v3817_v18  ;;  %v3717_v20 = vadd.f32 %v3602_v59, %v3347_v30  ;;  %v3350_v22 = vadd.f32 %v5177_v51, %v2980_v3  ;;  %v3605_v17 = vpop.f32.mrf.mxu0 }
 0x222   : > { %v3235_v48 = vpop.f32.mrf.mxu1  ;;  %v3822_v11 = vmul.f32 %v6315_v43, %v3719_v55  ;;  %v2984_v32 = vadd.f32 %v6227_v39, %v2613_v62  ;;  %v2982_v39 = vadd.f32 %v6233_v31, %v2611_v12 }
 0x223   : > { %4587 = vst [vmem:[%s6343_s24 + $0x8] sm:$0xff] %v4500_v4   ;;  %v4495_v1 = vpack.c.bf16 %v3856_v49, %v3855_v19  ;;  %v3348_v10 = vadd.f32 %v3235_v48, %v2978_v56  ;;  %v3720_v63 = vadd.f32 %v5225_v40, %v3350_v22  ;;  %v5228_v33 = vpop.f32.mrf.mxu0  ;;  %v3820_v8 = vmul.f32 %v6315_v43, %v3717_v20 }
 0x224   : > { %v5180_v35 = vpop.f32.mrf.mxu1  ;;  %v3861_v3 = vadd.f32 %v6326_v25, %v3822_v11  ;;  %v2617_v40 = vadd.f32 %v6239_v28, %v6140_v6 }
 0x225   : > { %4496 = vst [vmem:[%s6343_s24] sm:$0xff] %v4495_v1   ;;  %v3718_v61 = vadd.f32 %v3605_v17, %v3348_v10  ;;  %v3353_v58 = vadd.f32 %v5180_v35, %v6222_v0  ;;  %v3823_v47 = vmul.f32 %v6315_v43, %v3720_v63  ;;  %v3618_v59 = vpop.f32.mrf.mxu0  ;;  %v3859_v13 = vadd.f32 %v6326_v25, %v3820_v8 }
 0x226   : > { %v3248_v60 = vpop.f32.mrf.mxu1  ;;  %v2615_v10 = vadd.f32 %v6245_v21, %v6143_v14  ;;  %v2988_v28 = vadd.f32 %v6241_v50, %v2617_v40 }
 0x227   : > { %v3821_v44 = vmul.f32 %v6315_v43, %v3718_v61  ;;  %v3723_v18 = vadd.f32 %v5228_v33, %v3353_v58  ;;  %v3351_v30 = vadd.f32 %v3248_v60, %v6229_v5  ;;  %v3862_v56 = vadd.f32 %v6326_v25, %v3823_v47  ;;  %v5229_v55 = vpop.f32.mrf.mxu0 }
 0x228   : > { %v5181_v0 = vpop.f32.mrf.mxu1 }
 0x229   : > { %v3860_v27 = vadd.f32 %v6326_v25, %v3821_v44  ;;  %v3354_v51 = vadd.f32 %v5181_v0, %v2984_v32  ;;  %v4510_v19 = vpack.c.bf16 %v3862_v56, %v3861_v3  ;;  %v3721_v5 = vadd.f32 %v3618_v59, %v3351_v30  ;;  %v3621_v49 = vpop.f32.mrf.mxu0 }
 0x22a   : > { %v3251_v4 = vpop.f32.mrf.mxu1  ;;  %v3826_v22 = vmul.f32 %v6315_v43, %v3723_v18  ;;  %v2621_v0 = vadd.f32 %v6253_v15, %v6152_v2 }
 0x22b   : > { %v4505_v20 = vpack.c.bf16 %v3860_v27, %v3859_v13  ;;  %v3724_v48 = vadd.f32 %v5229_v55, %v3354_v51  ;;  %4589 = vst [vmem:[%s6343_s24 + $0x18] sm:$0xff] %v4510_v19   ;;  %v3352_v17 = vadd.f32 %v3251_v4, %v2982_v39  ;;  %v5232_v1 = vpop.f32.mrf.mxu0  ;;  %v3824_v11 = vmul.f32 %v6315_v43, %v3721_v5 }
 0x22c   : > { %v5184_v62 = vpop.f32.mrf.mxu1  ;;  %v3865_v8 = vadd.f32 %v6326_v25, %v3826_v22 }
 0x22d   : > { %4588 = vst [vmem:[%s6343_s24 + $0x10] sm:$0xff] %v4505_v20   ;;  %v3827_v31 = vmul.f32 %v6315_v43, %v3724_v48  ;;  %v3357_v6 = vadd.f32 %v5184_v62, %v6236_v29  ;;  %v3722_v63 = vadd.f32 %v3621_v49, %v3352_v17  ;;  %v3634_v33 = vpop.f32.mrf.mxu0  ;;  %v2986_v29 = vadd.f32 %v6247_v34, %v2615_v10 }
 0x22e   : > { %v3264_v35 = vpop.f32.mrf.mxu1  ;;  %v3863_v32 = vadd.f32 %v6326_v25, %v3824_v11  ;;  %v2619_v34 = vadd.f32 %v6259_v46, %v6155_v7  ;;  %v2992_v46 = vadd.f32 %v6255_v36, %v2621_v0 }
 0x22f   : > { %v3866_v61 = vadd.f32 %v6326_v25, %v3827_v31  ;;  %v3727_v58 = vadd.f32 %v5232_v1, %v3357_v6  ;;  %v3355_v14 = vadd.f32 %v3264_v35, %v6243_v52  ;;  %v3825_v21 = vmul.f32 %v6315_v43, %v3722_v63  ;;  %v5233_v47 = vpop.f32.mrf.mxu0 }
 0x230   : > { %v5185_v12 = vpop.f32.mrf.mxu1  ;;  %v2990_v20 = vadd.f32 %v6261_v38, %v2619_v34 }
 0x231   : > { %v4520_v50 = vpack.c.bf16 %v3866_v61, %v3865_v8  ;;  %v3725_v60 = vadd.f32 %v3634_v33, %v3355_v14  ;;  %v3358_v59 = vadd.f32 %v5185_v12, %v2988_v28  ;;  %v3864_v44 = vadd.f32 %v6326_v25, %v3825_v21  ;;  %v3637_v30 = vpop.f32.mrf.mxu0  ;;  %v6547_v12 = vld [vmem:[#allocation18_spill] sm:$0xff] }
 0x232   : > { %v3267_v18 = vpop.f32.mrf.mxu1  ;;  %v3830_v3 = vmul.f32 %v6315_v43, %v3727_v58  ;;  %v2623_v14 = vadd.f32 %v6273_v57, %v6167_v9 }
 0x233   : > { %4591 = vst [vmem:[%s6343_s24 + $0x28] sm:$0xff] %v4520_v50   ;;  %v3728_v52 = vadd.f32 %v5233_v47, %v3358_v59  ;;  %v3356_v56 = vadd.f32 %v3267_v18, %v2986_v29  ;;  %v4515_v55 = vpack.c.bf16 %v3864_v44, %v3863_v32  ;;  %v5236_v27 = vpop.f32.mrf.mxu0  ;;  %v3828_v51 = vmul.f32 %v6315_v43, %v3725_v60  ;;  %v6548_v60 = vld [vmem:[#allocation19_spill] sm:$0xff] }
 0x234   : > { %v5188_v13 = vpop.f32.mrf.mxu1  ;;  %v3869_v49 = vadd.f32 %v6326_v25, %v3830_v3  ;;  %v6549_v3 = vld [vmem:[#allocation20_spill] sm:$0xff] }
 0x235   : > { %v3831_v39 = vmul.f32 %v6315_v43, %v3728_v52  ;;  %v3726_v40 = vadd.f32 %v3637_v30, %v3356_v56  ;;  %v3361_v19 = vadd.f32 %v5188_v13, %v6250_v16  ;;  %4590 = vst [vmem:[%s6343_s24 + $0x20] sm:$0xff] %v4515_v55   ;;  %v3650_v4 = vpop.f32.mrf.mxu0  ;;  %v3867_v16 = vadd.f32 %v6326_v25, %v3828_v51  ;;  %v6550_v56 = vld [vmem:[#allocation14_spill] sm:$0xff] }
 0x236   : > { %v3280_v5 = vpop.f32.mrf.mxu1  ;;  %v2994_v52 = vadd.f32 %v6549_v3, %v2623_v14  ;;  %v2629_v0 = vadd.f32 %v6281_v23, %v6550_v56 }
 0x237   : > { %v3870_v2 = vadd.f32 %v6326_v25, %v3831_v39  ;;  %v3829_v7 = vmul.f32 %v6315_v43, %v3726_v40  ;;  %v3359_v15 = vadd.f32 %v3280_v5, %v6257_v26  ;;  %v3731_v22 = vadd.f32 %v5236_v27, %v3361_v19  ;;  %v5237_v17 = vpop.f32.mrf.mxu0 }
 0x238   : > { %v5189_v48 = vpop.f32.mrf.mxu1  ;;  %v2625_v26 = vadd.f32 %v6267_v54, %v6164_v41 }
 0x239   : > { %v4530_v62 = vpack.c.bf16 %v3870_v2, %v3869_v49  ;;  %v3868_v1 = vadd.f32 %v6326_v25, %v3829_v7  ;;  %v3729_v10 = vadd.f32 %v3650_v4, %v3359_v15  ;;  %v3362_v31 = vadd.f32 %v5189_v48, %v2992_v46  ;;  %v3653_v28 = vpop.f32.mrf.mxu0  ;;  %v6551_v49 = vld [vmem:[#allocation15_spill] sm:$0xff] }
 0x23a   : > { %v3283_v6 = vpop.f32.mrf.mxu1  ;;  %v3834_v38 = vmul.f32 %v6315_v43, %v3731_v22  ;;  %v2996_v47 = vadd.f32 %v6547_v12, %v2625_v26  ;;  %v2627_v2 = vadd.f32 %v6287_v42, %v6551_v49  ;;  %v3000_v15 = vadd.f32 %v6283_v37, %v2629_v0  ;;  %v6560_v0 = vld [vmem:[#allocation27_spill] sm:$0xff] }
 0x23b   : > { %4593 = vst [vmem:[%s6343_s24 + $0x38] sm:$0xff] %v4530_v62   ;;  %v4525_v36 = vpack.c.bf16 %v3868_v1, %v3867_v16  ;;  %v3360_v11 = vadd.f32 %v3283_v6, %v2990_v20  ;;  %v3732_v63 = vadd.f32 %v5237_v17, %v3362_v31  ;;  %v5240_v33 = vpop.f32.mrf.mxu0  ;;  %v3832_v8 = vmul.f32 %v6315_v43, %v3729_v10  ;;  %v6552_v1 = vld [vmem:[#allocation21_spill] sm:$0xff] }
 0x23c   : > { %v5192_v35 = vpop.f32.mrf.mxu1  ;;  %v3873_v32 = vadd.f32 %v6326_v25, %v3834_v38 }
 0x23d   : > { %4592 = vst [vmem:[%s6343_s24 + $0x30] sm:$0xff] %v4525_v36   ;;  %v3730_v61 = vadd.f32 %v3653_v28, %v3360_v11  ;;  %v3365_v58 = vadd.f32 %v5192_v35, %v6264_v24  ;;  %v3835_v21 = vmul.f32 %v6315_v43, %v3732_v63  ;;  %v3666_v54 = vpop.f32.mrf.mxu0  ;;  %v3871_v9 = vadd.f32 %v6326_v25, %v3832_v8 }
 0x23e   : > { %v3296_v41 = vpop.f32.mrf.mxu1 }
 0x23f   : > { %v3833_v29 = vmul.f32 %v6315_v43, %v3730_v61  ;;  %v3735_v50 = vadd.f32 %v5240_v33, %v3365_v58  ;;  %v3363_v59 = vadd.f32 %v3296_v41, %v6548_v60  ;;  %v3874_v44 = vadd.f32 %v6326_v25, %v3835_v21  ;;  %v5241_v18 = vpop.f32.mrf.mxu0  ;;  %v6554_v58 = vld [vmem:[#allocation16_spill] sm:$0xff]  ;;  %v6555_v21 = vld [vmem:[#allocation17_spill] sm:$0xff]  ;;  %v6556_v41 = vld [vmem:[#allocation26_spill] sm:$0xff] }
 0x240   : > { %v5193_v24 = vpop.f32.mrf.mxu1  ;;  %v2633_v14 = vadd.f32 %v6295_v53, %v6554_v58 }
 0x241   : > { %v3872_v57 = vadd.f32 %v6326_v25, %v3833_v29  ;;  %v3366_v30 = vadd.f32 %v5193_v24, %v2996_v47  ;;  %v4540_v34 = vpack.c.bf16 %v3874_v44, %v3873_v32  ;;  %v3733_v55 = vadd.f32 %v3666_v54, %v3363_v59  ;;  %v3669_v27 = vpop.f32.mrf.mxu0  ;;  %v6557_v32 = vld [vmem:[#allocation23_spill] sm:$0xff] }
 0x242   : > { %v3299_v13 = vpop.f32.mrf.mxu1  ;;  %v3838_v39 = vmul.f32 %v6315_v43, %v3735_v50  ;;  %v2631_v54 = vadd.f32 %v6556_v41, %v6555_v21 }
 0x243   : > { %v4535_v51 = vpack.c.bf16 %v3872_v57, %v3871_v9  ;;  %v3736_v40 = vadd.f32 %v5241_v18, %v3366_v30  ;;  %4595 = vst [vmem:[%s6343_s24 + $0x48] sm:$0xff] %v4540_v34   ;;  %v3364_v19 = vadd.f32 %v3299_v13, %v2994_v52  ;;  %v5244_v4 = vpop.f32.mrf.mxu0  ;;  %v3836_v46 = vmul.f32 %v6315_v43, %v3733_v55  ;;  %v6558_v30 = vld [vmem:[#allocation25_spill] sm:$0xff]  ;;  %v6559_v52 = vld [vmem:[#allocation24_spill] sm:$0xff] }
 0x244   : > { %v5196_v5 = vpop.f32.mrf.mxu1  ;;  %v3877_v17 = vadd.f32 %v6326_v25, %v3838_v39  ;;  %v3004_v56 = vadd.f32 %v6559_v52, %v2633_v14  ;;  %v3002_v34 = vadd.f32 %v6560_v0, %v2631_v54 }
 0x245   : > { %4594 = vst [vmem:[%s6343_s24 + $0x40] sm:$0xff] %v4535_v51   ;;  %v3839_v7 = vmul.f32 %v6315_v43, %v3736_v40  ;;  %v3369_v23 = vadd.f32 %v5196_v5, %v6278_v45  ;;  %v3734_v20 = vadd.f32 %v3669_v27, %v3364_v19  ;;  %v3682_v48 = vpop.f32.mrf.mxu0  ;;  %v6553_v45 = vld [vmem:[#allocation22_spill] sm:$0xff]  ;;  %v3875_v11 = vadd.f32 %v6326_v25, %v3836_v46 }
 0x246   : > { %v3312_v22 = vpop.f32.mrf.mxu1  ;;  %v2998_v28 = vadd.f32 %v6553_v45, %v2627_v2 }
 0x247   : > { %v3878_v16 = vadd.f32 %v6326_v25, %v3839_v7  ;;  %v3739_v62 = vadd.f32 %v5244_v4, %v3369_v23  ;;  %v3367_v42 = vadd.f32 %v3312_v22, %v6552_v1  ;;  %v3837_v10 = vmul.f32 %v6315_v43, %v3734_v20  ;;  %v5245_v6 = vpop.f32.mrf.mxu0 }
 0x248   : > { %v5197_v31 = vpop.f32.mrf.mxu1 }
 0x249   : > { %v4550_v37 = vpack.c.bf16 %v3878_v16, %v3877_v17  ;;  %v3737_v26 = vadd.f32 %v3682_v48, %v3367_v42  ;;  %v3370_v36 = vadd.f32 %v5197_v31, %v3000_v15  ;;  %v3876_v38 = vadd.f32 %v6326_v25, %v3837_v10  ;;  %v3685_v35 = vpop.f32.mrf.mxu0 }
 0x24a   : > { %v3315_v63 = vpop.f32.mrf.mxu1  ;;  %v3842_v33 = vmul.f32 %v6315_v43, %v3739_v62 }
 0x24b   : > { %4597 = vst [vmem:[%s6343_s24 + $0x58] sm:$0xff] %v4550_v37   ;;  %v3740_v8 = vadd.f32 %v5245_v6, %v3370_v36  ;;  %v3368_v61 = vadd.f32 %v3315_v63, %v2998_v28  ;;  %v4545_v12 = vpack.c.bf16 %v3876_v38, %v3875_v11  ;;  %v5248_v29 = vpop.f32.mrf.mxu0  ;;  %v3840_v50 = vmul.f32 %v6315_v43, %v3737_v26 }
 0x24c   : > { %v5200_v47 = vpop.f32.mrf.mxu1  ;;  %v3881_v9 = vadd.f32 %v6326_v25, %v3842_v33 }
 0x24d   : > { %v3843_v60 = vmul.f32 %v6315_v43, %v3740_v8  ;;  %v3738_v59 = vadd.f32 %v3685_v35, %v3368_v61  ;;  %v3373_v44 = vadd.f32 %v5200_v47, %v6557_v32  ;;  %4596 = vst [vmem:[%s6343_s24 + $0x50] sm:$0xff] %v4545_v12   ;;  %v3698_v18 = vpop.f32.mrf.mxu0  ;;  %v3879_v51 = vadd.f32 %v6326_v25, %v3840_v50 }
 0x24e   : > { %v3328_v24 = vpop.f32.mrf.mxu1 }
 0x24f   : > { %v3882_v53 = vadd.f32 %v6326_v25, %v3843_v60  ;;  %v3841_v57 = vmul.f32 %v6315_v43, %v3738_v59  ;;  %v3371_v3 = vadd.f32 %v3328_v24, %v6558_v30  ;;  %v3743_v55 = vadd.f32 %v5248_v29, %v3373_v44  ;;  %v5249_v27 = vpop.f32.mrf.mxu0 }
 0x250   : > { %v5201_v13 = vpop.f32.mrf.mxu1 }
 0x251   : > { %v4560_v39 = vpack.c.bf16 %v3882_v53, %v3881_v9  ;;  %v3880_v40 = vadd.f32 %v6326_v25, %v3841_v57  ;;  %v3741_v19 = vadd.f32 %v3698_v18, %v3371_v3  ;;  %v3374_v5 = vadd.f32 %v5201_v13, %v3004_v56  ;;  %v3701_v15 = vpop.f32.mrf.mxu0 }
 0x252   : > { %v3331_v4 = vpop.f32.mrf.mxu1  ;;  %v3846_v7 = vmul.f32 %v6315_v43, %v3743_v55 }
 0x253   : > { %4599 = vst [vmem:[%s6343_s24 + $0x68] sm:$0xff] %v4560_v39   ;;  %v4555_v49 = vpack.c.bf16 %v3880_v40, %v3879_v51  ;;  %v3372_v2 = vadd.f32 %v3331_v4, %v3002_v34  ;;  %v3744_v23 = vadd.f32 %v5249_v27, %v3374_v5  ;;  %v3844_v46 = vmul.f32 %v6315_v43, %v3741_v19 }
 0x254   : > { %v3885_v17 = vadd.f32 %v6326_v25, %v3846_v7 }
 0x255   : > { %4598 = vst [vmem:[%s6343_s24 + $0x60] sm:$0xff] %v4555_v49   ;;  %v3742_v20 = vadd.f32 %v3701_v15, %v3372_v2  ;;  %v3847_v22 = vmul.f32 %v6315_v43, %v3744_v23  ;;  %v3883_v62 = vadd.f32 %v6326_v25, %v3844_v46 }
 0x257   : > { %v3845_v48 = vmul.f32 %v6315_v43, %v3742_v20  ;;  %v3886_v16 = vadd.f32 %v6326_v25, %v3847_v22 }
 0x259   : > { %v3884_v1 = vadd.f32 %v6326_v25, %v3845_v48  ;;  %v4570_v42 = vpack.c.bf16 %v3886_v16, %v3885_v17 }
 0x25b   : > { %v4565_v43 = vpack.c.bf16 %v3884_v1, %v3883_v62  ;;  %4601 = vst [vmem:[%s6343_s24 + $0x78] sm:$0xff] %v4570_v42  }
 0x25d   : > { %4600 = vst [vmem:[%s6343_s24 + $0x70] sm:$0xff] %v4565_v43  }
 0x25e   : > { %5484 = shalt.err (!%p5481_p0)
}
 0x25f   : > { %s5485_s12 = scalar_lea.hbm %s6466_s11, 2048  ;;  %s5489_s23 = scalar_lea.hbm %s6517_s4, 4096 }
 0x260   : > { %p5486_p5 = scmp.ne.s32.totalorder %s6466_s11, %s5485_s12  ;;  %p5490_p4 = scmp.lt.s32.totalorder %s6466_s11, %s6517_s4 }
 0x261   : > { %p5491_p6 = scmp.lt.s32.totalorder %s5489_s23, %s5485_s12 }
 0x262   : > { %p5487_p2 = pnand %p5486_p5, %p6561_p11 }
 0x263   : > { %p5492_p8 = por %p5491_p6, %p5490_p4 }
 0x264   : > { %p5488_p1 = pneg %p5487_p2 }
 0x266   : > { %p5493_p3 = pnand %p5492_p8, %p5488_p1 }
 0x268   : > { %5496 = shalt.err (!%p5493_p3)
}
 0x269   : > { %s5548_s24 = smov 64   ;;  %s5549_s26 = smov 4  }
 0x26a   : > { %5272 = dma.vmem_to_hbm [thread:$0]  (%p6561_p11), %s6468_s29, 2048, %s6466_s11, %s4176_s19, %s5548_s24, %s5548_s24, %s5549_s26  }
 0x26b PF: > { %s4204_s13 = sand.u32 1, %s5527_s15   ;;  %p6562_p7 = scmp.ne.s32.totalorder %s6523_s22, 0 }
 0x26c   : > { %p6563_p9 = scmp.ge.s32.totalorder %s5539_s18, 2  ;;  %s4205_s14 = scalar_lea.sflag [#allocation7], %s4204_s13 }
 0x26e   : > { %p5283_p10 = pnand %p6563_p9, %p6562_p7 }
 0x270   : > { %p5284_p12 = pneg %p5283_p10 }
 0x272   : > { %5522 = dma.done.wait (%p5284_p12), %s4205_s14, 2048  }
 0x273   : > { %5524 = vsyncadd (%p5284_p12), %s4205_s14, 4294965248  ;;  %p18_p13 = scmp.ge.s32.totalorder %s5629_s27, 4   ;;  %s6564_s15 = smov %s5531_s16 }
 0x274   : > { %s6565_s16 = smov %s5535_s17  ;;  %s6566_s17 = smov %s5649_s9 }
 0x275   : > { %s6567_s18 = smov %s5629_s27  ;;  %20 = sbr.rel (!%p18_p13) target bundleno = 6 (0x6), region = 95 }
 0x27a   :  { %4210 = vsyncpa [#allocation6], 1 }
 0x27b   :  { %4212 = vsyncpa [#allocation6 + $0x1], 1 }
 0x27c   :  { %4213 = vsyncpa [#allocation9], 1 }
 0x27d   :  { %4214 = vsyncpa [#allocation7], 1 }
 0x27e   :  { %4216 = vsyncpa [#allocation7 + $0x1], 1 }

</bundles_post_ra>
